<compile_context>
chip_gen: v6e
topology: v6e:2x2x1
jax: 0.10.0
libtpu: 0.0.40
codegen_flags: <defaults>
</compile_context>

<pallas_src>
from functools import partial

import jax
import jax.numpy as jnp
from jax.experimental import pallas as pl
from jax.experimental.pallas import tpu as pltpu


def _fused_convnet_kernel(w_ref, x_ref, o_ref, pad_ref, *,
                          H, W, KH, KW, num_layers, threshold, steepness):
    """One grid step = one block of batch elements, all num_layers fused.

    w_ref  : (KH*KW,) f32 flattened shared kernel in SMEM
    x_ref  : (Nb, H, W) f32 input block in VMEM
    o_ref  : (num_layers, Nb, H, W) f32 stacked per-layer outputs in VMEM
    pad_ref: (Nb, H + 2*ph, W + 2*pw) f32 zero-halo scratch in VMEM
    """
    ph, pw = KH // 2, KW // 2

    # In-kernel 'same' zero-padding: zero the halo once, copy the interior.
    pad_ref[...] = jnp.zeros_like(pad_ref)
    pad_ref[:, ph:ph + H, pw:pw + W] = x_ref[...]

    for layer in range(num_layers):            # layers are sequential; static unroll
        xp = pad_ref[...]
        # Cross-correlation (PyTorch conv2d does NOT flip the kernel).
        # Accumulate in plain kh,kw order from zero so the FP op order matches
        # the reference exactly -- steepness=100 makes the sigmoid a near-step
        # and amplifies any numeric drift across layers.
        acc = jnp.zeros((xp.shape[0], H, W), jnp.float32)
        for kh in range(KH):
            for kw in range(KW):
                acc = acc + w_ref[kh * KW + kw] * xp[:, kh:kh + H, kw:kw + W]
        # activation = sigmoid(steepness * (conv - threshold)), exact divide
        # (no approx reciprocal: its error compounds through the sharp layers).
        z = steepness * (acc - threshold)
        act = 1.0 / (1.0 + jnp.exp(-z))
        o_ref[layer] = act.astype(o_ref.dtype)
        if layer + 1 < num_layers:
            # Next layer reads this activation through the same zero halo.
            pad_ref[:, ph:ph + H, pw:pw + W] = act


def _pick_batch_block(N, H, W, num_layers, KH, KW, budget_bytes=4 << 20):
    """Largest divisor of N whose per-step footprint stays well under even the
    v5e 16 MiB scoped-VMEM default (with double-buffered input/output)."""
    ph, pw = KH // 2, KW // 2
    best = 1
    for nb in range(1, N + 1):
        if N % nb:
            continue
        footprint = 4 * nb * (2 * H * W                        # input, double-buffered
                              + 2 * num_layers * H * W         # output, double-buffered
                              + (H + 2 * ph) * (W + 2 * pw))   # padded scratch
        if footprint <= budget_bytes:
            best = nb
    return best


def flexible_convnet_forward(x, shared_kernel, threshold, steepness, num_layers):
    """Reproduces FlexibleConvNet.forward with
    activation = sigmoid(steepness * (x - threshold)).

    x            : (N, 1, H, W) float32 (NCHW, single channel)
    shared_kernel: (KH, KW) float32, odd KH/KW
    Returns a list of num_layers tensors, each (N, 1, H, W) float32.
    """
    N, C, H, W = x.shape
    assert C == 1, "shared_kernel is 1x1xKHxKW -> input must have 1 channel"
    w = jnp.asarray(shared_kernel, jnp.float32)
    KH, KW = w.shape
    assert KH % 2 == 1 and KW % 2 == 1, "'same' padding assumes odd kernel dims"

    Nb = _pick_batch_block(N, H, W, num_layers, KH, KW)
    # TODO(synk): for very large H*W (single padded image > a few MiB), tile
    # spatially with a 1-row/1-col halo instead of whole-image batch blocks,
    # and present a lane-dense (>=128-wide) output slab.

    kernel = partial(_fused_convnet_kernel, H=H, W=W, KH=KH, KW=KW,
                     num_layers=num_layers,
                     threshold=float(threshold), steepness=float(steepness))
    out = pl.pallas_call(
        kernel,
        out_shape=jax.ShapeDtypeStruct((num_layers, N, H, W), jnp.float32),
        grid=(N // Nb,),
        in_specs=[
            # tiny (KH*KW,) weight vector: scalar reads from SMEM
            pl.BlockSpec(memory_space=pltpu.MemorySpace.SMEM),
            # one batch block per grid step
            pl.BlockSpec((Nb, H, W), lambda n: (n, 0, 0)),
        ],
        out_specs=pl.BlockSpec((num_layers, Nb, H, W), lambda n: (0, n, 0, 0)),
        scratch_shapes=[
            pltpu.VMEM((Nb, H + 2 * (KH // 2), W + 2 * (KW // 2)), jnp.float32),
        ],
        compiler_params=pltpu.CompilerParams(
            dimension_semantics=("parallel",)),   # batch blocks shard across TCs (v7x)
    )(w.reshape(-1), x[:, 0, :, :].astype(jnp.float32))

    return [out[l][:, None, :, :] for l in range(num_layers)]


if __name__ == "__main__":
    # Deterministic parameters (synthetic; no checkpoint loading).
    num_layers = 3
    threshold = 0.5
    steepness = 100.0
    shared_kernel = jnp.array(
        [[0.05, 0.10, 0.05],
         [0.10, 0.40, 0.10],
         [0.05, 0.10, 0.05]], dtype=jnp.float32)

    # Small input consistent with the module: NCHW with C=1.
    key = jax.random.PRNGKey(0)
    x = jax.random.normal(key, (2, 1, 16, 16), dtype=jnp.float32)

    outs = flexible_convnet_forward(x, shared_kernel, threshold, steepness,
                                    num_layers)
    for o in outs:
        jax.block_until_ready(o)
        assert o.shape == (2, 1, 16, 16) and o.dtype == jnp.float32

    # Pure-JAX reference (identical math / op order) sanity check.
    def ref_forward(xin):
        cur = xin[:, 0]
        refs = []
        for _ in range(num_layers):
            xp = jnp.pad(cur, ((0, 0), (1, 1), (1, 1)))
            acc = jnp.zeros_like(cur)
            for kh in range(3):
                for kw in range(3):
                    acc = acc + shared_kernel[kh, kw] * xp[:, kh:kh + 16, kw:kw + 16]
            z = steepness * (acc - threshold)
            cur = 1.0 / (1.0 + jnp.exp(-z))
            refs.append(cur[:, None])
        return refs

    for o, r in zip(outs, ref_forward(x)):
        assert float(jnp.max(jnp.abs(o - r))) < 5e-3

    print("KERNEL_OK")
</pallas_src>

<mosaic_0001>
module attributes {stable_mosaic.version = 11 : i64} {
  func.func @_fused_convnet_kernel(%arg0: i32, %arg1: memref<9xf32, #tpu.memory_space<smem>>, %arg2: memref<2x16x16xf32, #tpu.memory_space<vmem>>, %arg3: memref<3x2x16x16xf32, #tpu.memory_space<vmem>>, %arg4: memref<2x18x18xf32, #tpu.memory_space<vmem>>) attributes {dimension_semantics = [#tpu.dimension_semantics<parallel>], iteration_bounds = array<i64: 1>, scalar_prefetch = 0 : i64, scratch_operands = 1 : i64, tpu.core_type = #tpu.core_type<tc>, window_params = [{transform_indices = @transform_0, window_bounds = array<i64: 9>}, {transform_indices = @transform_1, window_bounds = array<i64: 2, 16, 16>}, {transform_indices = @transform_2, window_bounds = array<i64: 3, 2, 16, 16>}]} {
    %cst = arith.constant 0.000000e+00 : f32
    %0 = vector.broadcast %cst : f32 to vector<2x18x18xf32>
    %c0 = arith.constant 0 : index
    %c0_0 = arith.constant 0 : index
    %c0_1 = arith.constant 0 : index
    %1 = vector.load %arg4[%c0, %c0_0, %c0_1] : memref<2x18x18xf32, #tpu.memory_space<vmem>>, vector<2x18x18xf32>
    tpu.vector_store %arg4[%c0, %c0_0, %c0_1], %0 {strides = array<i32>} : memref<2x18x18xf32, #tpu.memory_space<vmem>>, vector<2x18x18xf32>,
    %c0_2 = arith.constant 0 : index
    %c0_3 = arith.constant 0 : index
    %c0_4 = arith.constant 0 : index
    %2 = vector.load %arg2[%c0_2, %c0_3, %c0_4] : memref<2x16x16xf32, #tpu.memory_space<vmem>>, vector<2x16x16xf32>
    %c0_5 = arith.constant 0 : index
    %c1 = arith.constant 1 : index
    %c1_6 = arith.constant 1 : index
    %3 = vector.load %arg4[%c0_5, %c1, %c1_6] : memref<2x18x18xf32, #tpu.memory_space<vmem>>, vector<2x16x16xf32>
    tpu.vector_store %arg4[%c0_5, %c1, %c1_6], %2 {strides = array<i32>} : memref<2x18x18xf32, #tpu.memory_space<vmem>>, vector<2x16x16xf32>,
    %c0_7 = arith.constant 0 : index
    %c0_8 = arith.constant 0 : index
    %c0_9 = arith.constant 0 : index
    %4 = vector.load %arg4[%c0_7, %c0_8, %c0_9] : memref<2x18x18xf32, #tpu.memory_space<vmem>>, vector<2x18x18xf32>
    %cst_10 = arith.constant 0.000000e+00 : f32
    %5 = vector.broadcast %cst_10 : f32 to vector<2x16x16xf32>
    %c0_11 = arith.constant 0 : index
    %6 = memref.load %arg1[%c0_11] : memref<9xf32, #tpu.memory_space<smem>>
    %7 = vector.extract_strided_slice %4 {offsets = [0, 0, 0], sizes = [2, 16, 16], strides = [1, 1, 1]} : vector<2x18x18xf32> to vector<2x16x16xf32>
    %8 = vector.broadcast %6 : f32 to vector<2x16x16xf32>
    %9 = arith.mulf %8, %7 : vector<2x16x16xf32>
    %10 = arith.addf %5, %9 : vector<2x16x16xf32>
    %c1_12 = arith.constant 1 : index
    %11 = memref.load %arg1[%c1_12] : memref<9xf32, #tpu.memory_space<smem>>
    %12 = vector.extract_strided_slice %4 {offsets = [0, 0, 1], sizes = [2, 16, 16], strides = [1, 1, 1]} : vector<2x18x18xf32> to vector<2x16x16xf32>
    %13 = vector.broadcast %11 : f32 to vector<2x16x16xf32>
    %14 = arith.mulf %13, %12 : vector<2x16x16xf32>
    %15 = arith.addf %10, %14 : vector<2x16x16xf32>
    %c2 = arith.constant 2 : index
    %16 = memref.load %arg1[%c2] : memref<9xf32, #tpu.memory_space<smem>>
    %17 = vector.extract_strided_slice %4 {offsets = [0, 0, 2], sizes = [2, 16, 16], strides = [1, 1, 1]} : vector<2x18x18xf32> to vector<2x16x16xf32>
    %18 = vector.broadcast %16 : f32 to vector<2x16x16xf32>
    %19 = arith.mulf %18, %17 : vector<2x16x16xf32>
    %20 = arith.addf %15, %19 : vector<2x16x16xf32>
    %c3 = arith.constant 3 : index
    %21 = memref.load %arg1[%c3] : memref<9xf32, #tpu.memory_space<smem>>
    %22 = vector.extract_strided_slice %4 {offsets = [0, 1, 0], sizes = [2, 16, 16], strides = [1, 1, 1]} : vector<2x18x18xf32> to vector<2x16x16xf32>
    %23 = vector.broadcast %21 : f32 to vector<2x16x16xf32>
    %24 = arith.mulf %23, %22 : vector<2x16x16xf32>
    %25 = arith.addf %20, %24 : vector<2x16x16xf32>
    %c4 = arith.constant 4 : index
    %26 = memref.load %arg1[%c4] : memref<9xf32, #tpu.memory_space<smem>>
    %27 = vector.extract_strided_slice %4 {offsets = [0, 1, 1], sizes = [2, 16, 16], strides = [1, 1, 1]} : vector<2x18x18xf32> to vector<2x16x16xf32>
    %28 = vector.broadcast %26 : f32 to vector<2x16x16xf32>
    %29 = arith.mulf %28, %27 : vector<2x16x16xf32>
    %30 = arith.addf %25, %29 : vector<2x16x16xf32>
    %c5 = arith.constant 5 : index
    %31 = memref.load %arg1[%c5] : memref<9xf32, #tpu.memory_space<smem>>
    %32 = vector.extract_strided_slice %4 {offsets = [0, 1, 2], sizes = [2, 16, 16], strides = [1, 1, 1]} : vector<2x18x18xf32> to vector<2x16x16xf32>
    %33 = vector.broadcast %31 : f32 to vector<2x16x16xf32>
    %34 = arith.mulf %33, %32 : vector<2x16x16xf32>
    %35 = arith.addf %30, %34 : vector<2x16x16xf32>
    %c6 = arith.constant 6 : index
    %36 = memref.load %arg1[%c6] : memref<9xf32, #tpu.memory_space<smem>>
    %37 = vector.extract_strided_slice %4 {offsets = [0, 2, 0], sizes = [2, 16, 16], strides = [1, 1, 1]} : vector<2x18x18xf32> to vector<2x16x16xf32>
    %38 = vector.broadcast %36 : f32 to vector<2x16x16xf32>
    %39 = arith.mulf %38, %37 : vector<2x16x16xf32>
    %40 = arith.addf %35, %39 : vector<2x16x16xf32>
    %c7 = arith.constant 7 : index
    %41 = memref.load %arg1[%c7] : memref<9xf32, #tpu.memory_space<smem>>
    %42 = vector.extract_strided_slice %4 {offsets = [0, 2, 1], sizes = [2, 16, 16], strides = [1, 1, 1]} : vector<2x18x18xf32> to vector<2x16x16xf32>
    %43 = vector.broadcast %41 : f32 to vector<2x16x16xf32>
    %44 = arith.mulf %43, %42 : vector<2x16x16xf32>
    %45 = arith.addf %40, %44 : vector<2x16x16xf32>
    %c8 = arith.constant 8 : index
    %46 = memref.load %arg1[%c8] : memref<9xf32, #tpu.memory_space<smem>>
    %47 = vector.extract_strided_slice %4 {offsets = [0, 2, 2], sizes = [2, 16, 16], strides = [1, 1, 1]} : vector<2x18x18xf32> to vector<2x16x16xf32>
    %48 = vector.broadcast %46 : f32 to vector<2x16x16xf32>
    %49 = arith.mulf %48, %47 : vector<2x16x16xf32>
    %50 = arith.addf %45, %49 : vector<2x16x16xf32>
    %cst_13 = arith.constant 5.000000e-01 : f32
    %51 = vector.broadcast %cst_13 : f32 to vector<2x16x16xf32>
    %52 = arith.subf %50, %51 : vector<2x16x16xf32>
    %cst_14 = arith.constant 1.000000e+02 : f32
    %53 = vector.broadcast %cst_14 : f32 to vector<2x16x16xf32>
    %54 = arith.mulf %53, %52 : vector<2x16x16xf32>
    %cst_15 = arith.constant 0.000000e+00 : f32
    %55 = vector.broadcast %cst_15 : f32 to vector<2x16x16xf32>
    %56 = arith.subf %55, %54 : vector<2x16x16xf32>
    %57 = math.exp %56 : vector<2x16x16xf32>
    %cst_16 = arith.constant 1.000000e+00 : f32
    %58 = vector.broadcast %cst_16 : f32 to vector<2x16x16xf32>
    %59 = arith.addf %58, %57 : vector<2x16x16xf32>
    %cst_17 = arith.constant 1.000000e+00 : f32
    %60 = vector.broadcast %cst_17 : f32 to vector<2x16x16xf32>
    %61 = arith.divf %60, %59 : vector<2x16x16xf32>
    %c0_18 = arith.constant 0 : index
    %c0_19 = arith.constant 0 : index
    %c0_20 = arith.constant 0 : index
    %c0_21 = arith.constant 0 : index
    %62 = vector.load %arg3[%c0_18, %c0_19, %c0_20, %c0_21] : memref<3x2x16x16xf32, #tpu.memory_space<vmem>>, vector<1x2x16x16xf32>
    %63 = vector.shape_cast %62 : vector<1x2x16x16xf32> to vector<2x16x16xf32>
    %64 = vector.shape_cast %61 : vector<2x16x16xf32> to vector<1x2x16x16xf32>
    tpu.vector_store %arg3[%c0_18, %c0_19, %c0_20, %c0_21], %64 {strides = array<i32>} : memref<3x2x16x16xf32, #tpu.memory_space<vmem>>, vector<1x2x16x16xf32>,
    %c0_22 = arith.constant 0 : index
    %c1_23 = arith.constant 1 : index
    %c1_24 = arith.constant 1 : index
    %65 = vector.load %arg4[%c0_22, %c1_23, %c1_24] : memref<2x18x18xf32, #tpu.memory_space<vmem>>, vector<2x16x16xf32>
    tpu.vector_store %arg4[%c0_22, %c1_23, %c1_24], %61 {strides = array<i32>} : memref<2x18x18xf32, #tpu.memory_space<vmem>>, vector<2x16x16xf32>,
    %c0_25 = arith.constant 0 : index
    %c0_26 = arith.constant 0 : index
    %c0_27 = arith.constant 0 : index
    %66 = vector.load %arg4[%c0_25, %c0_26, %c0_27] : memref<2x18x18xf32, #tpu.memory_space<vmem>>, vector<2x18x18xf32>
    %cst_28 = arith.constant 0.000000e+00 : f32
    %67 = vector.broadcast %cst_28 : f32 to vector<2x16x16xf32>
    %c0_29 = arith.constant 0 : index
    %68 = memref.load %arg1[%c0_29] : memref<9xf32, #tpu.memory_space<smem>>
    %69 = vector.extract_strided_slice %66 {offsets = [0, 0, 0], sizes = [2, 16, 16], strides = [1, 1, 1]} : vector<2x18x18xf32> to vector<2x16x16xf32>
    %70 = vector.broadcast %68 : f32 to vector<2x16x16xf32>
    %71 = arith.mulf %70, %69 : vector<2x16x16xf32>
    %72 = arith.addf %67, %71 : vector<2x16x16xf32>
    %c1_30 = arith.constant 1 : index
    %73 = memref.load %arg1[%c1_30] : memref<9xf32, #tpu.memory_space<smem>>
    %74 = vector.extract_strided_slice %66 {offsets = [0, 0, 1], sizes = [2, 16, 16], strides = [1, 1, 1]} : vector<2x18x18xf32> to vector<2x16x16xf32>
    %75 = vector.broadcast %73 : f32 to vector<2x16x16xf32>
    %76 = arith.mulf %75, %74 : vector<2x16x16xf32>
    %77 = arith.addf %72, %76 : vector<2x16x16xf32>
    %c2_31 = arith.constant 2 : index
    %78 = memref.load %arg1[%c2_31] : memref<9xf32, #tpu.memory_space<smem>>
    %79 = vector.extract_strided_slice %66 {offsets = [0, 0, 2], sizes = [2, 16, 16], strides = [1, 1, 1]} : vector<2x18x18xf32> to vector<2x16x16xf32>
    %80 = vector.broadcast %78 : f32 to vector<2x16x16xf32>
    %81 = arith.mulf %80, %79 : vector<2x16x16xf32>
    %82 = arith.addf %77, %81 : vector<2x16x16xf32>
    %c3_32 = arith.constant 3 : index
    %83 = memref.load %arg1[%c3_32] : memref<9xf32, #tpu.memory_space<smem>>
    %84 = vector.extract_strided_slice %66 {offsets = [0, 1, 0], sizes = [2, 16, 16], strides = [1, 1, 1]} : vector<2x18x18xf32> to vector<2x16x16xf32>
    %85 = vector.broadcast %83 : f32 to vector<2x16x16xf32>
    %86 = arith.mulf %85, %84 : vector<2x16x16xf32>
    %87 = arith.addf %82, %86 : vector<2x16x16xf32>
    %c4_33 = arith.constant 4 : index
    %88 = memref.load %arg1[%c4_33] : memref<9xf32, #tpu.memory_space<smem>>
    %89 = vector.extract_strided_slice %66 {offsets = [0, 1, 1], sizes = [2, 16, 16], strides = [1, 1, 1]} : vector<2x18x18xf32> to vector<2x16x16xf32>
    %90 = vector.broadcast %88 : f32 to vector<2x16x16xf32>
    %91 = arith.mulf %90, %89 : vector<2x16x16xf32>
    %92 = arith.addf %87, %91 : vector<2x16x16xf32>
    %c5_34 = arith.constant 5 : index
    %93 = memref.load %arg1[%c5_34] : memref<9xf32, #tpu.memory_space<smem>>
    %94 = vector.extract_strided_slice %66 {offsets = [0, 1, 2], sizes = [2, 16, 16], strides = [1, 1, 1]} : vector<2x18x18xf32> to vector<2x16x16xf32>
    %95 = vector.broadcast %93 : f32 to vector<2x16x16xf32>
    %96 = arith.mulf %95, %94 : vector<2x16x16xf32>
    %97 = arith.addf %92, %96 : vector<2x16x16xf32>
    %c6_35 = arith.constant 6 : index
    %98 = memref.load %arg1[%c6_35] : memref<9xf32, #tpu.memory_space<smem>>
    %99 = vector.extract_strided_slice %66 {offsets = [0, 2, 0], sizes = [2, 16, 16], strides = [1, 1, 1]} : vector<2x18x18xf32> to vector<2x16x16xf32>
    %100 = vector.broadcast %98 : f32 to vector<2x16x16xf32>
    %101 = arith.mulf %100, %99 : vector<2x16x16xf32>
    %102 = arith.addf %97, %101 : vector<2x16x16xf32>
    %c7_36 = arith.constant 7 : index
    %103 = memref.load %arg1[%c7_36] : memref<9xf32, #tpu.memory_space<smem>>
    %104 = vector.extract_strided_slice %66 {offsets = [0, 2, 1], sizes = [2, 16, 16], strides = [1, 1, 1]} : vector<2x18x18xf32> to vector<2x16x16xf32>
    %105 = vector.broadcast %103 : f32 to vector<2x16x16xf32>
    %106 = arith.mulf %105, %104 : vector<2x16x16xf32>
    %107 = arith.addf %102, %106 : vector<2x16x16xf32>
    %c8_37 = arith.constant 8 : index
    %108 = memref.load %arg1[%c8_37] : memref<9xf32, #tpu.memory_space<smem>>
    %109 = vector.extract_strided_slice %66 {offsets = [0, 2, 2], sizes = [2, 16, 16], strides = [1, 1, 1]} : vector<2x18x18xf32> to vector<2x16x16xf32>
    %110 = vector.broadcast %108 : f32 to vector<2x16x16xf32>
    %111 = arith.mulf %110, %109 : vector<2x16x16xf32>
    %112 = arith.addf %107, %111 : vector<2x16x16xf32>
    %cst_38 = arith.constant 5.000000e-01 : f32
    %113 = vector.broadcast %cst_38 : f32 to vector<2x16x16xf32>
    %114 = arith.subf %112, %113 : vector<2x16x16xf32>
    %cst_39 = arith.constant 1.000000e+02 : f32
    %115 = vector.broadcast %cst_39 : f32 to vector<2x16x16xf32>
    %116 = arith.mulf %115, %114 : vector<2x16x16xf32>
    %cst_40 = arith.constant 0.000000e+00 : f32
    %117 = vector.broadcast %cst_40 : f32 to vector<2x16x16xf32>
    %118 = arith.subf %117, %116 : vector<2x16x16xf32>
    %119 = math.exp %118 : vector<2x16x16xf32>
    %cst_41 = arith.constant 1.000000e+00 : f32
    %120 = vector.broadcast %cst_41 : f32 to vector<2x16x16xf32>
    %121 = arith.addf %120, %119 : vector<2x16x16xf32>
    %cst_42 = arith.constant 1.000000e+00 : f32
    %122 = vector.broadcast %cst_42 : f32 to vector<2x16x16xf32>
    %123 = arith.divf %122, %121 : vector<2x16x16xf32>
    %c1_43 = arith.constant 1 : index
    %c0_44 = arith.constant 0 : index
    %c0_45 = arith.constant 0 : index
    %c0_46 = arith.constant 0 : index
    %124 = vector.load %arg3[%c1_43, %c0_44, %c0_45, %c0_46] : memref<3x2x16x16xf32, #tpu.memory_space<vmem>>, vector<1x2x16x16xf32>
    %125 = vector.shape_cast %124 : vector<1x2x16x16xf32> to vector<2x16x16xf32>
    %126 = vector.shape_cast %123 : vector<2x16x16xf32> to vector<1x2x16x16xf32>
    tpu.vector_store %arg3[%c1_43, %c0_44, %c0_45, %c0_46], %126 {strides = array<i32>} : memref<3x2x16x16xf32, #tpu.memory_space<vmem>>, vector<1x2x16x16xf32>,
    %c0_47 = arith.constant 0 : index
    %c1_48 = arith.constant 1 : index
    %c1_49 = arith.constant 1 : index
    %127 = vector.load %arg4[%c0_47, %c1_48, %c1_49] : memref<2x18x18xf32, #tpu.memory_space<vmem>>, vector<2x16x16xf32>
    tpu.vector_store %arg4[%c0_47, %c1_48, %c1_49], %123 {strides = array<i32>} : memref<2x18x18xf32, #tpu.memory_space<vmem>>, vector<2x16x16xf32>,
    %c0_50 = arith.constant 0 : index
    %c0_51 = arith.constant 0 : index
    %c0_52 = arith.constant 0 : index
    %128 = vector.load %arg4[%c0_50, %c0_51, %c0_52] : memref<2x18x18xf32, #tpu.memory_space<vmem>>, vector<2x18x18xf32>
    %cst_53 = arith.constant 0.000000e+00 : f32
    %129 = vector.broadcast %cst_53 : f32 to vector<2x16x16xf32>
    %c0_54 = arith.constant 0 : index
    %130 = memref.load %arg1[%c0_54] : memref<9xf32, #tpu.memory_space<smem>>
    %131 = vector.extract_strided_slice %128 {offsets = [0, 0, 0], sizes = [2, 16, 16], strides = [1, 1, 1]} : vector<2x18x18xf32> to vector<2x16x16xf32>
    %132 = vector.broadcast %130 : f32 to vector<2x16x16xf32>
    %133 = arith.mulf %132, %131 : vector<2x16x16xf32>
    %134 = arith.addf %129, %133 : vector<2x16x16xf32>
    %c1_55 = arith.constant 1 : index
    %135 = memref.load %arg1[%c1_55] : memref<9xf32, #tpu.memory_space<smem>>
    %136 = vector.extract_strided_slice %128 {offsets = [0, 0, 1], sizes = [2, 16, 16], strides = [1, 1, 1]} : vector<2x18x18xf32> to vector<2x16x16xf32>
    %137 = vector.broadcast %135 : f32 to vector<2x16x16xf32>
    %138 = arith.mulf %137, %136 : vector<2x16x16xf32>
    %139 = arith.addf %134, %138 : vector<2x16x16xf32>
    %c2_56 = arith.constant 2 : index
    %140 = memref.load %arg1[%c2_56] : memref<9xf32, #tpu.memory_space<smem>>
    %141 = vector.extract_strided_slice %128 {offsets = [0, 0, 2], sizes = [2, 16, 16], strides = [1, 1, 1]} : vector<2x18x18xf32> to vector<2x16x16xf32>
    %142 = vector.broadcast %140 : f32 to vector<2x16x16xf32>
    %143 = arith.mulf %142, %141 : vector<2x16x16xf32>
    %144 = arith.addf %139, %143 : vector<2x16x16xf32>
    %c3_57 = arith.constant 3 : index
    %145 = memref.load %arg1[%c3_57] : memref<9xf32, #tpu.memory_space<smem>>
    %146 = vector.extract_strided_slice %128 {offsets = [0, 1, 0], sizes = [2, 16, 16], strides = [1, 1, 1]} : vector<2x18x18xf32> to vector<2x16x16xf32>
    %147 = vector.broadcast %145 : f32 to vector<2x16x16xf32>
    %148 = arith.mulf %147, %146 : vector<2x16x16xf32>
    %149 = arith.addf %144, %148 : vector<2x16x16xf32>
    %c4_58 = arith.constant 4 : index
    %150 = memref.load %arg1[%c4_58] : memref<9xf32, #tpu.memory_space<smem>>
    %151 = vector.extract_strided_slice %128 {offsets = [0, 1, 1], sizes = [2, 16, 16], strides = [1, 1, 1]} : vector<2x18x18xf32> to vector<2x16x16xf32>
    %152 = vector.broadcast %150 : f32 to vector<2x16x16xf32>
    %153 = arith.mulf %152, %151 : vector<2x16x16xf32>
    %154 = arith.addf %149, %153 : vector<2x16x16xf32>
    %c5_59 = arith.constant 5 : index
    %155 = memref.load %arg1[%c5_59] : memref<9xf32, #tpu.memory_space<smem>>
    %156 = vector.extract_strided_slice %128 {offsets = [0, 1, 2], sizes = [2, 16, 16], strides = [1, 1, 1]} : vector<2x18x18xf32> to vector<2x16x16xf32>
    %157 = vector.broadcast %155 : f32 to vector<2x16x16xf32>
    %158 = arith.mulf %157, %156 : vector<2x16x16xf32>
    %159 = arith.addf %154, %158 : vector<2x16x16xf32>
    %c6_60 = arith.constant 6 : index
    %160 = memref.load %arg1[%c6_60] : memref<9xf32, #tpu.memory_space<smem>>
    %161 = vector.extract_strided_slice %128 {offsets = [0, 2, 0], sizes = [2, 16, 16], strides = [1, 1, 1]} : vector<2x18x18xf32> to vector<2x16x16xf32>
    %162 = vector.broadcast %160 : f32 to vector<2x16x16xf32>
    %163 = arith.mulf %162, %161 : vector<2x16x16xf32>
    %164 = arith.addf %159, %163 : vector<2x16x16xf32>
    %c7_61 = arith.constant 7 : index
    %165 = memref.load %arg1[%c7_61] : memref<9xf32, #tpu.memory_space<smem>>
    %166 = vector.extract_strided_slice %128 {offsets = [0, 2, 1], sizes = [2, 16, 16], strides = [1, 1, 1]} : vector<2x18x18xf32> to vector<2x16x16xf32>
    %167 = vector.broadcast %165 : f32 to vector<2x16x16xf32>
    %168 = arith.mulf %167, %166 : vector<2x16x16xf32>
    %169 = arith.addf %164, %168 : vector<2x16x16xf32>
    %c8_62 = arith.constant 8 : index
    %170 = memref.load %arg1[%c8_62] : memref<9xf32, #tpu.memory_space<smem>>
    %171 = vector.extract_strided_slice %128 {offsets = [0, 2, 2], sizes = [2, 16, 16], strides = [1, 1, 1]} : vector<2x18x18xf32> to vector<2x16x16xf32>
    %172 = vector.broadcast %170 : f32 to vector<2x16x16xf32>
    %173 = arith.mulf %172, %171 : vector<2x16x16xf32>
    %174 = arith.addf %169, %173 : vector<2x16x16xf32>
    %cst_63 = arith.constant 5.000000e-01 : f32
    %175 = vector.broadcast %cst_63 : f32 to vector<2x16x16xf32>
    %176 = arith.subf %174, %175 : vector<2x16x16xf32>
    %cst_64 = arith.constant 1.000000e+02 : f32
    %177 = vector.broadcast %cst_64 : f32 to vector<2x16x16xf32>
    %178 = arith.mulf %177, %176 : vector<2x16x16xf32>
    %cst_65 = arith.constant 0.000000e+00 : f32
    %179 = vector.broadcast %cst_65 : f32 to vector<2x16x16xf32>
    %180 = arith.subf %179, %178 : vector<2x16x16xf32>
    %181 = math.exp %180 : vector<2x16x16xf32>
    %cst_66 = arith.constant 1.000000e+00 : f32
    %182 = vector.broadcast %cst_66 : f32 to vector<2x16x16xf32>
    %183 = arith.addf %182, %181 : vector<2x16x16xf32>
    %cst_67 = arith.constant 1.000000e+00 : f32
    %184 = vector.broadcast %cst_67 : f32 to vector<2x16x16xf32>
    %185 = arith.divf %184, %183 : vector<2x16x16xf32>
    %c2_68 = arith.constant 2 : index
    %c0_69 = arith.constant 0 : index
    %c0_70 = arith.constant 0 : index
    %c0_71 = arith.constant 0 : index
    %186 = vector.load %arg3[%c2_68, %c0_69, %c0_70, %c0_71] : memref<3x2x16x16xf32, #tpu.memory_space<vmem>>, vector<1x2x16x16xf32>
    %187 = vector.shape_cast %186 : vector<1x2x16x16xf32> to vector<2x16x16xf32>
    %188 = vector.shape_cast %185 : vector<2x16x16xf32> to vector<1x2x16x16xf32>
    tpu.vector_store %arg3[%c2_68, %c0_69, %c0_70, %c0_71], %188 {strides = array<i32>} : memref<3x2x16x16xf32, #tpu.memory_space<vmem>>, vector<1x2x16x16xf32>,
    return
  }
  func.func @transform_0(%arg0: i32) -> i32 {
    %c0_i32 = arith.constant 0 : i32
    %c0_i32_0 = arith.constant 0 : i32
    return %c0_i32 : i32
  }
  func.func @transform_1(%arg0: i32) -> (i32, i32, i32) {
    %c0_i32 = arith.constant 0 : i32
    %c0_i32_0 = arith.constant 0 : i32
    %c0_i32_1 = arith.constant 0 : i32
    return %arg0, %c0_i32, %c0_i32_0 : i32, i32, i32
  }
  func.func @transform_2(%arg0: i32) -> (i32, i32, i32, i32) {
    %c0_i32 = arith.constant 0 : i32
    %c0_i32_0 = arith.constant 0 : i32
    %c0_i32_1 = arith.constant 0 : i32
    %c0_i32_2 = arith.constant 0 : i32
    return %c0_i32, %arg0, %c0_i32_0, %c0_i32_1 : i32, i32, i32, i32
  }
}

</mosaic_0001>

<bundles_post_ra>
// kernel: tpu_custom_call.1
= control target key start
LH: loop header
LB: loop body
LE: loop exit
PB: predicated region body
PF: predicated region fallthrough
CT: control target
= control target key end

     0   :  { %7 = vsyncpa [#allocation6], 0  ;;  %s1818_s0 = inlined_call_operand.hbm [shape: f32[9], index: 0, kind: input, shape index: {}]   ;;  %s1819_s1 = inlined_call_operand.hbm [shape: f32[2,16,16], index: 1, kind: input, shape index: {}]   ;;  %s1820_s2 = inlined_call_operand.hbm [shape: f32[3,2,16,16], index: 2, kind: output, shape index: {}]  }
   0x1   :  { %8 = vsyncpa [#allocation4], 0 }
   0x2   :  { %9 = vsyncpa [#allocation5], 0  ;;  %s1264_s9 = smov [#allocation3]   ;;  %s1265_s12 = smov [#allocation7]  }
   0x3   :  { %17 = dma.hbm_to_smem %s1818_s0, 16, %s1264_s9, [#allocation6]  }
   0x4   :  { %s23_s13 = sshll.u32 %s1265_s12, 4  ;;  %s24_s13 = int_to_ptr.vmem [resolvable:$true] %s23_s13 }
   0x5   :  { %s1226_s14 = scalar_lea.vmem %s24_s13, 512  ;;  %p1231_p1 = scmp.lt.s32.totalorder %s24_s13, %s24_s13 }
   0x6   :  { %p1227_p0 = scmp.ne.s32.totalorder %s24_s13, %s1226_s14  ;;  %p1232_p2 = scmp.lt.s32.totalorder %s1226_s14, %s1226_s14 }
   0x8   :  { %p1233_p3 = por %p1232_p2, %p1231_p1 }
   0xa   :  { %p1234_p4 = pnand %p1233_p3, %p1227_p0 }
   0xc   :  { %1237 = shalt.err (!%p1234_p4)
}
   0xd   :  { %s1266_s15 = smov 128   ;;  %s1267_s16 = smov 8  }
   0xe   :  { %29 = dma.hbm_to_vmem [thread:$0]  %s1819_s1, 512, %s24_s13, [#allocation4], %s1266_s15, %s1266_s15, %s1267_s16  }
   0xf   :  { %1258 = dma.done.wait [#allocation6], 16  }
  0x10   :  { %1259 = vsyncadd [#allocation6], 4294967280 }
  0x11   :  { %1260 = dma.done.wait [#allocation4], 512  }
  0x12   :  { %1261 = vsyncadd [#allocation4], 4294966784 }
  0x13   :  { %36 = sfence }
  0x14   :  { %v47_v0 = vld [vmem:[#allocation7 + $0x10] sm:$0xff]  ;;  %v45_v1 = vld [vmem:[#allocation7] sm:$0xff]  ;;  %vm37_vm0 = vcmask 146432   ;;  %s1268_s0 = smov 1   ;;  %vm40_vm1 = vcmask 140288   ;;  %v48_v2 = vld [vmem:[#allocation7 + $0x18] sm:$0xff] }
  0x15   :  { %57 = vrot.lane.b32.xlu1 %v47_v0, %s1268_s0  ;;  %53 = vrot.lane.b32.xlu0 %v45_v1, %s1268_s0  ;;  %v46_v3 = vld [vmem:[#allocation7 + $0x8] sm:$0xff]  ;;  %v1269_v4 = vmov 0.0   ;;  %vm65_vm2 = vcmask 138248   ;;  %s1117_s1 = sld [smem:[#allocation3 + $0x1]]  ;;  %s1270_s21 = smov 127   ;;  %vm152_vm3 = vcmask 1046528  }
  0x16   :  { %42 = vst.msk [vmem:[#allocation2 + $0x18] sm:$0xff] %vm37_vm0, %v1269_v4  ;;  %43 = vst.msk [vmem:[#allocation2 + $0x20] sm:$0xff] %vm37_vm0, %v1269_v4  ;;  %s1118_s19 = sld [smem:[#allocation3 + $0x2]]  ;;  %s1271_s23 = smov 126   ;;  %vm265_vm4 = vcmask 1045504   ;;  %vm396_vm5 = vcmask 130048  }
  0x17   :  { %38 = vst.msk [vmem:[#allocation2] sm:$0xff] %vm37_vm0, %v1269_v4  ;;  %39 = vst.msk [vmem:[#allocation2 + $0x8] sm:$0xff] %vm37_vm0, %v1269_v4  ;;  %s1120_s20 = sld [smem:[#allocation3 + $0x4]]  ;;  %s1272_s10 = smov [#allocation8]  }
  0x18   :  { %44 = vst.msk [vmem:[#allocation2 + $0x28] sm:$0x3] %vm40_vm1, %v1269_v4  ;;  %41 = vst.msk [vmem:[#allocation2 + $0x10] sm:$0x3] %vm40_vm1, %v1269_v4  ;;  %s1121_s22 = sld [smem:[#allocation3 + $0x5]]  ;;  %s1104_s11 = sshll.u32 %s1272_s10, 4  ;;  %s1105_s11 = int_to_ptr.vmem [resolvable:$true] %s1104_s11 }
  0x19   :  { %59 = vrot.lane.b32.xlu1 %v48_v2, %s1268_s0  ;;  %55 = vrot.lane.b32.xlu0 %v46_v3, %s1268_s0  ;;  %s1123_s24 = sld [smem:[#allocation3 + $0x7]]  ;;  %s1238_s12 = scalar_lea.vmem %s1105_s11, 1536 }
  0x1a   :  { %s1124_s25 = sld [smem:[#allocation3 + $0x8]]  ;;  %p1239_p5 = scmp.ne.s32.totalorder %s1105_s11, %s1238_s12 }
  0x1b   :  { %v1305_v9 = vstv %s1117_s1  ;;  %s76_s26 = sld [smem:[#allocation3]]  ;;  %p1243_p6 = scmp.lt.s32.totalorder %s1105_s11, %s1105_s11 }
  0x1c   :  { %v1322_v17 = vstv %s1118_s19  ;;  %s1119_s27 = sld [smem:[#allocation3 + $0x3]]  ;;  %p1244_p7 = scmp.lt.s32.totalorder %s1238_s12, %s1238_s12 }
  0x1d   :  { %v1330_v20 = vstv %s1120_s20  ;;  %s1122_s28 = sld [smem:[#allocation3 + $0x6]] }
  0x1e   :  { %v1358_v35 = vstv %s1121_s22  ;;  %s1141_s29 = sld [smem:[#allocation3 + $0x1]]  ;;  %p1245_p8 = por %p1244_p7, %p1243_p6 }
  0x1f   :  { %v1377_v52 = vstv %s1123_s24  ;;  %s1142_s30 = sld [smem:[#allocation3 + $0x2]] }
  0x20   :  { %v1399_v2 = vstv %s1124_s25  ;;  %s1144_s3 = sld [smem:[#allocation3 + $0x4]]  ;;  %p1246_p9 = pnand %p1245_p8, %p1239_p5 }
  0x21   :  { %s1145_s4 = sld [smem:[#allocation3 + $0x5]] }
  0x22   :  { %s1143_s5 = sld [smem:[#allocation3 + $0x3]] }
  0x23   :  { %s1146_s6 = sld [smem:[#allocation3 + $0x6]] }
  0x24   :  { %s1147_s7 = sld [smem:[#allocation3 + $0x7]] }
  0x25   :  { %s1729_s8 = sld [smem:[#allocation3 + $0x8]] }
  0x26   :  { %s776_s9 = sld [smem:[#allocation3]] }
  0x87   :  { %v58_v5 = vpop.permute.xlu1 %57  ;;  %v54_v6 = vpop.permute.xlu0 %53 }
  0x88   :  { %68 = vst.msk [vmem:[#allocation2 + $0x19] sm:$0xff] %vm65_vm2, %v58_v5  ;;  %66 = vst.msk [vmem:[#allocation2 + $0x1] sm:$0xff] %vm65_vm2, %v54_v6 }
  0x8b   :  { %v60_v7 = vpop.permute.xlu1 %59  ;;  %v56_v8 = vpop.permute.xlu0 %55 }
  0x8c   :  { %69 = vst.msk [vmem:[#allocation2 + $0x21] sm:$0xff] %vm65_vm2, %v60_v7  ;;  %67 = vst.msk [vmem:[#allocation2 + $0x9] sm:$0xff] %vm65_vm2, %v56_v8 }
  0x8f   :  { %v1307_v10 = vld [vmem:[#allocation2] sm:$0xff]  ;;  %v1309_v11 = vld [vmem:[#allocation2 + $0x18] sm:$0xff] }
  0x90   :  { %v88_v12 = vmul.f32 %v1305_v9, %v1307_v10  ;;  %v90_v13 = vmul.f32 %v1305_v9, %v1309_v11  ;;  %v114_v19 = vmul.f32 %v1322_v17, %v1307_v10  ;;  %v173_v23 = vmul.f32 %v1330_v20, %v1307_v10 }
  0x91   :  { %v116_v25 = vmul.f32 %v1322_v17, %v1309_v11  ;;  %v176_v26 = vmul.f32 %v1330_v20, %v1309_v11  ;;  %v213_v40 = vmul.f32 %v1358_v35, %v1307_v10  ;;  %v216_v42 = vmul.f32 %v1358_v35, %v1309_v11 }
  0x92   :  { %96 = vrot.lane.b32.xlu0 %v88_v12, %s1270_s21  ;;  %v185_v31 = vrot.slane %v173_v23, 1  ;;  %v286_v57 = vmul.f32 %v1377_v52, %v1307_v10  ;;  %v289_v60 = vmul.f32 %v1377_v52, %v1309_v11 }
  0x93   :  { %v1316_v14 = vld [vmem:[#allocation2 + $0x8] sm:$0xff]  ;;  %v1320_v16 = vld [vmem:[#allocation2 + $0x20] sm:$0xff]  ;;  %v1336_v22 = vld [vmem:[#allocation2 + $0x10] sm:$0x3]  ;;  %v190_v33 = vrot.slane %v176_v26, 1  ;;  %v225_v48 = vrot.slane %v213_v40, 1 }
  0x94   :  { %v89_v15 = vmul.f32 %v1305_v9, %v1316_v14  ;;  %v91_v18 = vmul.f32 %v1305_v9, %v1320_v16  ;;  %v174_v21 = vmul.f32 %v1330_v20, %v1316_v14  ;;  %v115_v24 = vmul.f32 %v1322_v17, %v1316_v14  ;;  %v1350_v30 = vld [vmem:[#allocation2 + $0x28] sm:$0x3] }
  0x95   :  { %v175_v28 = vmul.f32 %v1330_v20, %v1336_v22  ;;  %v177_v29 = vmul.f32 %v1330_v20, %v1320_v16  ;;  %v117_v32 = vmul.f32 %v1322_v17, %v1320_v16  ;;  %v178_v34 = vmul.f32 %v1330_v20, %v1350_v30 }
  0x96   :  { %98 = vrot.lane.b32.xlu1 %v89_v15, %s1270_s21  ;;  %100 = vrot.lane.b32.xlu0 %v90_v13, %s1270_s21  ;;  %v186_v27 = vrot.slane %v174_v21, 1  ;;  %v214_v39 = vmul.f32 %v1358_v35, %v1316_v14  ;;  %v215_v41 = vmul.f32 %v1358_v35, %v1336_v22  ;;  %v217_v43 = vmul.f32 %v1358_v35, %v1320_v16 }
  0x97   :  { %v188_v37 = vrot.slane %v175_v28, 1  ;;  %v191_v38 = vrot.slane %v177_v29, 1  ;;  %v193_v46 = vrot.slane %v178_v34, 1  ;;  %v230_v50 = vrot.slane %v216_v42, 1 }
  0x98   :  { %v187_v36 = vsel %vm152_vm3, %v185_v31, %v186_v27  ;;  %v226_v47 = vrot.slane %v214_v39, 1  ;;  %v228_v49 = vrot.slane %v215_v41, 1  ;;  %v231_v51 = vrot.slane %v217_v43, 1 }
  0x99   :  { %v189_v44 = vsel %vm152_vm3, %v186_v27, %v188_v37  ;;  %v192_v45 = vsel %vm152_vm3, %v190_v33, %v191_v38  ;;  %v194_v53 = vsel %vm152_vm3, %v191_v38, %v193_v46  ;;  %v218_v55 = vmul.f32 %v1358_v35, %v1350_v30 }
  0x9a   :  { %102 = vrot.lane.b32.xlu1 %v91_v18, %s1270_s21  ;;  %122 = vrot.lane.b32.xlu0 %v114_v19, %s1271_s23  ;;  %v227_v54 = vsel %vm152_vm3, %v225_v48, %v226_v47  ;;  %v287_v56 = vmul.f32 %v1377_v52, %v1316_v14  ;;  %v229_v58 = vsel %vm152_vm3, %v226_v47, %v228_v49  ;;  %v298_v1 = vrot.slane %v286_v57, 2 }
  0x9b   :  { %v232_v59 = vsel %vm152_vm3, %v230_v50, %v231_v51  ;;  %v233_v61 = vrot.slane %v218_v55, 1  ;;  %v288_v63 = vmul.f32 %v1377_v52, %v1336_v22  ;;  %v290_v0 = vmul.f32 %v1377_v52, %v1320_v16 }
  0x9c   :  { %v299_v62 = vrot.slane %v287_v56, 2  ;;  %v303_v3 = vrot.slane %v289_v60, 2  ;;  %v291_v4 = vmul.f32 %v1377_v52, %v1350_v30  ;;  %v327_v5 = vmul.f32 %v1399_v2, %v1316_v14 }
  0x9d   :  { %v234_v6 = vsel %vm152_vm3, %v231_v51, %v233_v61  ;;  %v301_v8 = vrot.slane %v288_v63, 2  ;;  %v304_v12 = vrot.slane %v290_v0, 2  ;;  %v326_v13 = vmul.f32 %v1399_v2, %v1307_v10 }
  0x9e   :  { %124 = vrot.lane.b32.xlu1 %v115_v24, %s1271_s23  ;;  %126 = vrot.lane.b32.xlu0 %v116_v25, %s1271_s23  ;;  %v300_v7 = vsel %vm265_vm4, %v298_v1, %v299_v62  ;;  %v306_v15 = vrot.slane %v291_v4, 2  ;;  %v339_v18 = vrot.slane %v327_v5, 2  ;;  %v329_v19 = vmul.f32 %v1399_v2, %v1309_v11 }
  0x9f   :  { %v302_v21 = vsel %vm265_vm4, %v299_v62, %v301_v8  ;;  %v305_v23 = vsel %vm265_vm4, %v303_v3, %v304_v12  ;;  %v328_v24 = vmul.f32 %v1399_v2, %v1336_v22  ;;  %v330_v25 = vmul.f32 %v1399_v2, %v1320_v16 }
  0xa0   :  { %v338_v26 = vrot.slane %v326_v13, 2  ;;  %v307_v27 = vsel %vm265_vm4, %v304_v12, %v306_v15  ;;  %v343_v31 = vrot.slane %v329_v19, 2  ;;  %v331_v33 = vmul.f32 %v1399_v2, %v1350_v30 }
  0xa1   :  { %v341_v29 = vrot.slane %v328_v24, 2  ;;  %v1433_v48 = vstv %s76_s26  ;;  %v1435_v49 = vstv %s1119_s27  ;;  %v1455_v8 = vstv %s1122_s28 }
  0xa2   :  { %128 = vrot.lane.b32.xlu1 %v117_v32, %s1271_s23  ;;  %195 = vrot.lane.b32.xlu0 %v187_v36, %s1270_s21  ;;  %v340_v28 = vsel %vm265_vm4, %v338_v26, %v339_v18  ;;  %v344_v32 = vrot.slane %v330_v25, 2  ;;  %v346_v37 = vrot.slane %v331_v33, 2  ;;  %v141_v50 = vmul.f32 %v1435_v49, %v1316_v14 }
  0xa3   :  { %v342_v34 = vsel %vm265_vm4, %v339_v18, %v341_v29  ;;  %v140_v55 = vmul.f32 %v1435_v49, %v1307_v10  ;;  %v142_v57 = vmul.f32 %v1435_v49, %v1336_v22  ;;  %v144_v60 = vmul.f32 %v1435_v49, %v1320_v16 }
  0xa4   :  { %v345_v36 = vsel %vm265_vm4, %v343_v31, %v344_v32  ;;  %v347_v38 = vsel %vm265_vm4, %v344_v32, %v346_v37  ;;  %v79_v63 = vmul.f32 %v1433_v48, %v1316_v14  ;;  %v80_v0 = vmul.f32 %v1433_v48, %v1309_v11 }
  0xa5   :  { %v153_v3 = vrot.slane %v140_v55, 1  ;;  %v145_v4 = vmul.f32 %v1435_v49, %v1350_v30  ;;  %v159_v15 = vrot.slane %v144_v60, 1  ;;  %v255_v33 = vmul.f32 %v1455_v8, %v1336_v22 }
  0xa6   :  { %197 = vrot.lane.b32.xlu1 %v189_v44, %s1270_s21  ;;  %199 = vrot.lane.b32.xlu0 %v192_v45, %s1270_s21 }
  0xaa   :  { %201 = vrot.lane.b32.xlu1 %v194_v53, %s1270_s21  ;;  %235 = vrot.lane.b32.xlu0 %v227_v54, %s1271_s23  ;;  %v78_v54 = vmul.f32 %v1433_v48, %v1307_v10 }
  0xae   :  { %237 = vrot.lane.b32.xlu1 %v229_v58, %s1271_s23  ;;  %239 = vrot.lane.b32.xlu0 %v232_v59, %s1271_s23  ;;  %v154_v58 = vrot.slane %v141_v50, 1  ;;  %v143_v59 = vmul.f32 %v1435_v49, %v1309_v11 }
  0xb0   :  { %v155_v12 = vsel %vm152_vm3, %v153_v3, %v154_v58  ;;  %v158_v13 = vrot.slane %v143_v59, 1 }
  0xb2   :  { %241 = vrot.lane.b32.xlu1 %v234_v6, %s1271_s23  ;;  %308 = vrot.lane.b32.xlu0 %v300_v7, %s1270_s21  ;;  %v156_v7 = vrot.slane %v142_v57, 1 }
  0xb4   :  { %v157_v32 = vsel %vm152_vm3, %v154_v58, %v156_v7 }
  0xb6   :  { %310 = vrot.lane.b32.xlu1 %v302_v21, %s1270_s21  ;;  %312 = vrot.lane.b32.xlu0 %v305_v23, %s1270_s21  ;;  %v254_v21 = vmul.f32 %v1455_v8, %v1316_v14  ;;  %v81_v23 = vmul.f32 %v1433_v48, %v1320_v16 }
  0xba   :  { %314 = vrot.lane.b32.xlu1 %v307_v27, %s1270_s21  ;;  %348 = vrot.lane.b32.xlu0 %v340_v28, %s1271_s23  ;;  %v161_v27 = vrot.slane %v145_v4, 1  ;;  %v253_v28 = vmul.f32 %v1455_v8, %v1307_v10 }
  0xbc   :  { %v162_v22 = vsel %vm152_vm3, %v159_v15, %v161_v27 }
  0xbe   :  { %350 = vrot.lane.b32.xlu1 %v342_v34, %s1271_s23  ;;  %352 = vrot.lane.b32.xlu0 %v345_v36, %s1271_s23  ;;  %v160_v34 = vsel %vm152_vm3, %v158_v13, %v159_v15  ;;  %v267_v36 = vrot.slane %v254_v21, 2 }
  0xc2   :  { %354 = vrot.lane.b32.xlu1 %v347_v38, %s1271_s23  ;;  %v256_v38 = vmul.f32 %v1455_v8, %v1309_v11  ;;  %v258_v11 = vmul.f32 %v1455_v8, %v1350_v30 }
  0xc4   :  { %v271_v55 = vrot.slane %v256_v38, 2 }
 0x104   :  { %v97_v39 = vpop.permute.xlu0 %96 }
 0x105   :  { %v108_v56 = vadd.f32 %v97_v39, %v78_v54  ;;  %v257_v39 = vmul.f32 %v1455_v8, %v1320_v16 }
 0x108   :  { %v99_v40 = vpop.permute.xlu1 %98  ;;  %v101_v41 = vpop.permute.xlu0 %100 }
 0x109   :  { %v109_v5 = vadd.f32 %v99_v40, %v79_v63  ;;  %v110_v6 = vadd.f32 %v101_v41, %v80_v0  ;;  %v274_v63 = vrot.slane %v258_v11, 2 }
 0x10c   :  { %v103_v42 = vpop.permute.xlu1 %102  ;;  %v123_v43 = vpop.permute.xlu0 %122 }
 0x10d   :  { %v134_v1 = vadd.f32 %v123_v43, %v108_v56  ;;  %v111_v29 = vadd.f32 %v103_v42, %v81_v23  ;;  %v266_v43 = vrot.slane %v253_v28, 2  ;;  %v272_v56 = vrot.slane %v257_v39, 2 }
 0x10f   :  { %v167_v26 = vadd.f32 %v155_v12, %v134_v1  ;;  %v268_v50 = vsel %vm265_vm4, %v266_v43, %v267_v36  ;;  %v275_v13 = vsel %vm265_vm4, %v272_v56, %v274_v63 }
 0x110   :  { %v125_v44 = vpop.permute.xlu1 %124  ;;  %v127_v45 = vpop.permute.xlu0 %126 }
 0x111   :  { %v135_v24 = vadd.f32 %v125_v44, %v109_v5  ;;  %v136_v25 = vadd.f32 %v127_v45, %v110_v6 }
 0x113   :  { %v168_v10 = vadd.f32 %v157_v32, %v135_v24  ;;  %v169_v41 = vadd.f32 %v160_v34, %v136_v25 }
 0x114   :  { %v129_v46 = vpop.permute.xlu1 %128  ;;  %v196_v47 = vpop.permute.xlu0 %195 }
 0x115   :  { %v207_v31 = vadd.f32 %v196_v47, %v167_v26  ;;  %v137_v40 = vadd.f32 %v129_v46, %v111_v29  ;;  %v269_v47 = vrot.slane %v255_v33, 2 }
 0x117   :  { %v170_v16 = vadd.f32 %v162_v22, %v137_v40 }
 0x118   :  { %v198_v51 = vpop.permute.xlu1 %197  ;;  %v200_v53 = vpop.permute.xlu0 %199 }
 0x119   :  { %v208_v44 = vadd.f32 %v198_v51, %v168_v10  ;;  %v209_v45 = vadd.f32 %v200_v53, %v169_v41  ;;  %v270_v51 = vsel %vm265_vm4, %v267_v36, %v269_v47  ;;  %v273_v53 = vsel %vm265_vm4, %v271_v55, %v272_v56 }
 0x11c   :  { %v202_v61 = vpop.permute.xlu1 %201  ;;  %v236_v62 = vpop.permute.xlu0 %235 }
 0x11d   :  { %v247_v42 = vadd.f32 %v236_v62, %v207_v31  ;;  %v210_v60 = vadd.f32 %v202_v61, %v170_v16 }
 0x11f   :  { %v280_v59 = vadd.f32 %v268_v50, %v247_v42 }
 0x120   :  { %v238_v18 = vpop.permute.xlu1 %237  ;;  %v240_v19 = vpop.permute.xlu0 %239 }
 0x121   :  { %v248_v46 = vadd.f32 %v238_v18, %v208_v44  ;;  %v249_v58 = vadd.f32 %v240_v19, %v209_v45 }
 0x123   :  { %v281_v4 = vadd.f32 %v270_v51, %v248_v46  ;;  %v282_v5 = vadd.f32 %v273_v53, %v249_v58 }
 0x124   :  { %v242_v14 = vpop.permute.xlu1 %241  ;;  %v309_v37 = vpop.permute.xlu0 %308 }
 0x125   :  { %v320_v62 = vadd.f32 %v309_v37, %v280_v59  ;;  %v250_v3 = vadd.f32 %v242_v14, %v210_v60 }
 0x127   :  { %v283_v61 = vadd.f32 %v275_v13, %v250_v3 }
 0x128   :  { %v311_v54 = vpop.permute.xlu1 %310  ;;  %v313_v57 = vpop.permute.xlu0 %312 }
 0x129   :  { %v321_v7 = vadd.f32 %v311_v54, %v281_v4  ;;  %v322_v12 = vadd.f32 %v313_v57, %v282_v5 }
 0x12c   :  { %v315_v0 = vpop.permute.xlu1 %314  ;;  %v349_v1 = vpop.permute.xlu0 %348 }
 0x12d   :  { %v360_v6 = vadd.f32 %v349_v1, %v320_v62  ;;  %v323_v24 = vadd.f32 %v315_v0, %v283_v61 }
 0x12f   :  { %v1125_v30 = vadd.f32 -0.5, %v360_v6 }
 0x130   :  { %v351_v15 = vpop.permute.xlu1 %350  ;;  %v353_v18 = vpop.permute.xlu0 %352 }
 0x131   :  { %v368_v19 = vmul.f32 100.0, %v1125_v30  ;;  %v361_v21 = vadd.f32 %v351_v15, %v321_v7  ;;  %v362_v23 = vadd.f32 %v353_v18, %v322_v12 }
 0x133   :  { %v372_v25 = vsub.f32 0.0, %v368_v19  ;;  %v1126_v26 = vadd.f32 -0.5, %v361_v21  ;;  %v1127_v27 = vadd.f32 -0.5, %v362_v23 }
 0x134   :  { %v355_v28 = vpop.permute.xlu1 %354 }
 0x135   :  { %v376_v29 = vmul.f32 1.442695, %v372_v25  ;;  %v369_v31 = vmul.f32 100.0, %v1126_v26  ;;  %v370_v32 = vmul.f32 100.0, %v1127_v27  ;;  %v363_v33 = vadd.f32 %v355_v28, %v323_v24 }
 0x137   :  { %1162 = vpow2.f32 %v376_v29  ;;  %v373_v34 = vsub.f32 0.0, %v369_v31  ;;  %v374_v14 = vsub.f32 0.0, %v370_v32  ;;  %v1128_v36 = vadd.f32 -0.5, %v363_v33 }
 0x139   :  { %v378_v37 = vmul.f32 1.442695, %v373_v34  ;;  %v380_v38 = vmul.f32 1.442695, %v374_v14  ;;  %v371_v39 = vmul.f32 100.0, %v1128_v36 }
 0x13b   :  { %1164 = vpow2.f32 %v378_v37  ;;  %v375_v40 = vsub.f32 0.0, %v371_v39 }
 0x13c   :  { %1166 = vpow2.f32 %v380_v38 }
 0x13d   :  { %v382_v10 = vmul.f32 1.442695, %v375_v40 }
 0x13f   :  { %1168 = vpow2.f32 %v382_v10 }
 0x144   :  { %v1163_v41 = vpop.eup %1162 }
 0x145   :  { %v384_v42 = vadd.f32 1.0, %v1163_v41 }
 0x147   :  { %1170 = vrcp.f32 %v384_v42 }
 0x148   :  { %v1165_v43 = vpop.eup %1164 }
 0x149   :  { %v1167_v44 = vpop.eup %1166  ;;  %v385_v45 = vadd.f32 1.0, %v1165_v43 }
 0x14a   :  { %v386_v22 = vadd.f32 1.0, %v1167_v44 }
 0x14b   :  { %1172 = vrcp.f32 %v385_v45 }
 0x14c   :  { %v1169_v47 = vpop.eup %1168  ;;  %1174 = vrcp.f32 %v386_v22 }
 0x14d   :  { %v387_v50 = vadd.f32 1.0, %v1169_v47 }
 0x14f   :  { %1176 = vrcp.f32 %v387_v50 }
 0x154   :  { %v1171_v54 = vpop.eup %1170 }
 0x155   :  { %397 = vst.msk [vmem:[#allocation8] sm:$0xff] %vm396_vm5, %v1171_v54  ;;  %405 = vrot.lane.b32.xlu0 %v1171_v54, %s1268_s0 }
 0x158   :  { %v1173_v55 = vpop.eup %1172 }
 0x159   :  { %v1175_v56 = vpop.eup %1174  ;;  %398 = vst.msk [vmem:[#allocation8 + $0x8] sm:$0xff] %vm396_vm5, %v1173_v55  ;;  %407 = vrot.lane.b32.xlu1 %v1173_v55, %s1268_s0 }
 0x15a   :  { %399 = vst.msk [vmem:[#allocation8 + $0x10] sm:$0xff] %vm396_vm5, %v1175_v56  ;;  %409 = vrot.lane.b32.xlu0 %v1175_v56, %s1268_s0 }
 0x15c   :  { %v1177_v57 = vpop.eup %1176 }
 0x15d   :  { %400 = vst.msk [vmem:[#allocation8 + $0x18] sm:$0xff] %vm396_vm5, %v1177_v57  ;;  %411 = vrot.lane.b32.xlu1 %v1177_v57, %s1268_s0 }
 0x1c7   :  { %v406_v11 = vpop.permute.xlu0 %405 }
 0x1c8   :  { %417 = vst.msk [vmem:[#allocation2 + $0x1] sm:$0xff] %vm65_vm2, %v406_v11 }
 0x1cb   :  { %v408_v16 = vpop.permute.xlu1 %407 }
 0x1cc   :  { %418 = vst.msk [vmem:[#allocation2 + $0x9] sm:$0xff] %vm65_vm2, %v408_v16  ;;  %v410_v46 = vpop.permute.xlu0 %409 }
 0x1cd   :  { %419 = vst.msk [vmem:[#allocation2 + $0x19] sm:$0xff] %vm65_vm2, %v410_v46 }
 0x1cf   :  { %v412_v58 = vpop.permute.xlu1 %411  ;;  %v1490_v59 = vld [vmem:[#allocation2] sm:$0xff] }
 0x1d0   :  { %420 = vst.msk [vmem:[#allocation2 + $0x21] sm:$0xff] %vm65_vm2, %v412_v58  ;;  %v439_v60 = vmul.f32 %v1490_v59, %v1305_v9  ;;  %v465_v3 = vmul.f32 %v1490_v59, %v1322_v17  ;;  %v523_v7 = vmul.f32 %v1490_v59, %v1330_v20  ;;  %v635_v42 = vmul.f32 %v1490_v59, %v1377_v52 }
 0x1d2   :  { %447 = vrot.lane.b32.xlu0 %v439_v60, %s1270_s21  ;;  %v535_v61 = vrot.slane %v523_v7, 1  ;;  %v647_v50 = vrot.slane %v635_v42, 2  ;;  %v675_v60 = vmul.f32 %v1490_v59, %v1399_v2 }
 0x1d3   :  { %v1496_v62 = vld [vmem:[#allocation2 + $0x8] sm:$0xff]  ;;  %v1515_v5 = vld [vmem:[#allocation2 + $0x10] sm:$0x3] }
 0x1d4   :  { %v440_v51 = vmul.f32 %v1496_v62, %v1305_v9  ;;  %v1500_v53 = vld [vmem:[#allocation2 + $0x18] sm:$0xff]  ;;  %v524_v4 = vmul.f32 %v1496_v62, %v1330_v20  ;;  %v466_v6 = vmul.f32 %v1496_v62, %v1322_v17  ;;  %v525_v12 = vmul.f32 %v1515_v5, %v1330_v20 }
 0x1d5   :  { %v441_v63 = vmul.f32 %v1500_v53, %v1305_v9  ;;  %v526_v19 = vmul.f32 %v1500_v53, %v1330_v20  ;;  %v564_v26 = vmul.f32 %v1496_v62, %v1358_v35  ;;  %v566_v14 = vmul.f32 %v1500_v53, %v1358_v35 }
 0x1d6   :  { %449 = vrot.lane.b32.xlu1 %v440_v51, %s1270_s21  ;;  %v536_v30 = vrot.slane %v524_v4, 1  ;;  %v538_v21 = vrot.slane %v525_v12, 1  ;;  %v636_v10 = vmul.f32 %v1496_v62, %v1377_v52  ;;  %v638_v54 = vmul.f32 %v1500_v53, %v1377_v52 }
 0x1d7   :  { %451 = vrot.lane.b32.xlu0 %v441_v63, %s1270_s21  ;;  %v1506_v0 = vld [vmem:[#allocation2 + $0x20] sm:$0xff]  ;;  %v1529_v15 = vld [vmem:[#allocation2 + $0x28] sm:$0x3]  ;;  %v540_v27 = vrot.slane %v526_v19, 1  ;;  %v576_v32 = vrot.slane %v564_v26, 1  ;;  %v580_v41 = vrot.slane %v566_v14, 1  ;;  %v676_v46 = vmul.f32 %v1496_v62, %v1399_v2 }
 0x1d8   :  { %v442_v1 = vmul.f32 %v1506_v0, %v1305_v9  ;;  %v467_v9 = vmul.f32 %v1500_v53, %v1322_v17  ;;  %v527_v13 = vmul.f32 %v1506_v0, %v1330_v20  ;;  %v468_v18 = vmul.f32 %v1506_v0, %v1322_v17 }
 0x1d9   :  { %v528_v23 = vmul.f32 %v1529_v15, %v1330_v20  ;;  %v537_v24 = vsel %vm152_vm3, %v535_v61, %v536_v30  ;;  %v563_v17 = vmul.f32 %v1490_v59, %v1358_v35  ;;  %v539_v28 = vsel %vm152_vm3, %v536_v30, %v538_v21 }
 0x1da   :  { %453 = vrot.lane.b32.xlu1 %v442_v1, %s1270_s21  ;;  %v541_v25 = vrot.slane %v527_v13, 1  ;;  %v565_v20 = vmul.f32 %v1515_v5, %v1358_v35  ;;  %v567_v33 = vmul.f32 %v1506_v0, %v1358_v35  ;;  %v568_v38 = vmul.f32 %v1529_v15, %v1358_v35 }
 0x1db   :  { %473 = vrot.lane.b32.xlu0 %v465_v3, %s1271_s23  ;;  %v543_v29 = vrot.slane %v528_v23, 1  ;;  %v575_v34 = vrot.slane %v563_v17, 1  ;;  %v637_v35 = vmul.f32 %v1515_v5, %v1377_v52  ;;  %v648_v22 = vrot.slane %v636_v10, 2 }
 0x1dc   :  { %v542_v31 = vsel %vm152_vm3, %v540_v27, %v541_v25  ;;  %v578_v37 = vrot.slane %v565_v20, 1  ;;  %v581_v40 = vrot.slane %v567_v33, 1  ;;  %v583_v44 = vrot.slane %v568_v38, 1 }
 0x1dd   :  { %v544_v36 = vsel %vm152_vm3, %v541_v25, %v543_v29  ;;  %v577_v39 = vsel %vm152_vm3, %v575_v34, %v576_v32  ;;  %v639_v47 = vmul.f32 %v1506_v0, %v1377_v52  ;;  %v650_v56 = vrot.slane %v637_v35, 2 }
 0x1de   :  { %475 = vrot.lane.b32.xlu1 %v466_v6, %s1271_s23  ;;  %v579_v43 = vsel %vm152_vm3, %v576_v32, %v578_v37  ;;  %v582_v45 = vsel %vm152_vm3, %v580_v41, %v581_v40  ;;  %v584_v55 = vsel %vm152_vm3, %v581_v40, %v583_v44  ;;  %v640_v57 = vmul.f32 %v1529_v15, %v1377_v52 }
 0x1df   :  { %477 = vrot.lane.b32.xlu0 %v467_v9, %s1271_s23  ;;  %v649_v11 = vsel %vm265_vm4, %v647_v50, %v648_v22  ;;  %v653_v16 = vrot.slane %v639_v47, 2  ;;  %v652_v58 = vrot.slane %v638_v54, 2  ;;  %v651_v51 = vsel %vm265_vm4, %v648_v22, %v650_v56 }
 0x1e0   :  { %v655_v63 = vrot.slane %v640_v57, 2  ;;  %v677_v52 = vmul.f32 %v1515_v5, %v1399_v2  ;;  %v688_v3 = vrot.slane %v676_v46, 2  ;;  %v679_v4 = vmul.f32 %v1506_v0, %v1399_v2 }
 0x1e1   :  { %v654_v1 = vsel %vm265_vm4, %v652_v58, %v653_v16  ;;  %v687_v6 = vrot.slane %v675_v60, 2  ;;  %v678_v7 = vmul.f32 %v1500_v53, %v1399_v2  ;;  %v680_v30 = vmul.f32 %v1529_v15, %v1399_v2 }
 0x1e2   :  { %479 = vrot.lane.b32.xlu1 %v468_v18, %s1271_s23  ;;  %v656_v9 = vsel %vm265_vm4, %v653_v16, %v655_v63  ;;  %v690_v12 = vrot.slane %v677_v52, 2  ;;  %v693_v18 = vrot.slane %v679_v4, 2  ;;  %v492_v33 = vmul.f32 %v1496_v62, %v1435_v49 }
 0x1e3   :  { %545 = vrot.lane.b32.xlu0 %v537_v24, %s1270_s21  ;;  %v689_v13 = vsel %vm265_vm4, %v687_v6, %v688_v3  ;;  %v692_v61 = vrot.slane %v678_v7, 2  ;;  %v695_v21 = vrot.slane %v680_v30, 2  ;;  %v429_v14 = vmul.f32 %v1490_v59, %v1433_v48 }
 0x1e4   :  { %v691_v19 = vsel %vm265_vm4, %v688_v3, %v690_v12  ;;  %v493_v38 = vmul.f32 %v1515_v5, %v1435_v49  ;;  %v430_v40 = vmul.f32 %v1496_v62, %v1433_v48  ;;  %v504_v10 = vrot.slane %v492_v33, 1 }
 0x1e5   :  { %v694_v23 = vsel %vm265_vm4, %v692_v61, %v693_v18  ;;  %v696_v24 = vsel %vm265_vm4, %v693_v18, %v695_v21  ;;  %v495_v41 = vmul.f32 %v1506_v0, %v1435_v49  ;;  %v494_v22 = vmul.f32 %v1500_v53, %v1435_v49 }
 0x1e6   :  { %547 = vrot.lane.b32.xlu1 %v539_v28, %s1270_s21  ;;  %v506_v50 = vrot.slane %v493_v38, 1  ;;  %v496_v54 = vmul.f32 %v1529_v15, %v1435_v49  ;;  %v604_v56 = vmul.f32 %v1496_v62, %v1455_v8  ;;  %v432_v57 = vmul.f32 %v1506_v0, %v1433_v48 }
 0x1e7   :  { %549 = vrot.lane.b32.xlu0 %v542_v31, %s1270_s21  ;;  %v509_v46 = vrot.slane %v495_v41, 1  ;;  %v508_v52 = vrot.slane %v494_v22, 1 }
 0x1e8   :  { %v507_v62 = vsel %vm152_vm3, %v504_v10, %v506_v50  ;;  %v511_v4 = vrot.slane %v496_v54, 1  ;;  %v616_v6 = vrot.slane %v604_v56, 2 }
 0x1e9   :  { %v510_v12 = vsel %vm152_vm3, %v508_v52, %v509_v46 }
 0x1ea   :  { %551 = vrot.lane.b32.xlu1 %v544_v36, %s1270_s21  ;;  %v491_v36 = vmul.f32 %v1490_v59, %v1435_v49  ;;  %v605_v49 = vmul.f32 %v1515_v5, %v1455_v8  ;;  %v606_v5 = vmul.f32 %v1500_v53, %v1455_v8 }
 0x1eb   :  { %585 = vrot.lane.b32.xlu0 %v577_v39, %s1271_s23 }
 0x1ee   :  { %587 = vrot.lane.b32.xlu1 %v579_v43, %s1271_s23  ;;  %v431_v43 = vmul.f32 %v1500_v53, %v1433_v48 }
 0x1ef   :  { %589 = vrot.lane.b32.xlu0 %v582_v45, %s1271_s23  ;;  %v503_v45 = vrot.slane %v491_v36, 1 }
 0x1f1   :  { %v505_v16 = vsel %vm152_vm3, %v503_v45, %v504_v10 }
 0x1f2   :  { %591 = vrot.lane.b32.xlu1 %v584_v55, %s1271_s23 }
 0x1f3   :  { %657 = vrot.lane.b32.xlu0 %v649_v11, %s1270_s21 }
 0x1f6   :  { %659 = vrot.lane.b32.xlu1 %v651_v51, %s1270_s21 }
 0x1f7   :  { %661 = vrot.lane.b32.xlu0 %v654_v1, %s1270_s21  ;;  %v603_v1 = vmul.f32 %v1490_v59, %v1455_v8 }
 0x1fa   :  { %663 = vrot.lane.b32.xlu1 %v656_v9, %s1270_s21 }
 0x1fb   :  { %697 = vrot.lane.b32.xlu0 %v689_v13, %s1271_s23  ;;  %v607_v13 = vmul.f32 %v1506_v0, %v1455_v8 }
 0x1fd   :  { %v621_v0 = vrot.slane %v607_v13, 2 }
 0x1fe   :  { %699 = vrot.lane.b32.xlu1 %v691_v19, %s1271_s23  ;;  %v615_v19 = vrot.slane %v603_v1, 2 }
 0x1ff   :  { %701 = vrot.lane.b32.xlu0 %v694_v23, %s1271_s23  ;;  %v512_v23 = vsel %vm152_vm3, %v509_v46, %v511_v4 }
 0x202   :  { %703 = vrot.lane.b32.xlu1 %v696_v24, %s1271_s23  ;;  %v618_v24 = vrot.slane %v605_v49, 2 }
 0x204   :  { %v619_v53 = vsel %vm265_vm4, %v616_v6, %v618_v24  ;;  %v787_v24 = vstv %s1141_s29 }
 0x244   :  { %v448_v2 = vpop.permute.xlu0 %447 }
 0x245   :  { %v459_v37 = vadd.f32 %v448_v2, %v429_v14 }
 0x248   :  { %v450_v25 = vpop.permute.xlu1 %449 }
 0x249   :  { %v452_v26 = vpop.permute.xlu0 %451  ;;  %v460_v35 = vadd.f32 %v450_v25, %v430_v40  ;;  %v608_v25 = vmul.f32 %v1529_v15, %v1455_v8 }
 0x24a   :  { %v461_v47 = vadd.f32 %v452_v26, %v431_v43 }
 0x24c   :  { %v454_v27 = vpop.permute.xlu1 %453 }
 0x24d   :  { %v474_v17 = vpop.permute.xlu0 %473  ;;  %v462_v63 = vadd.f32 %v454_v27, %v432_v57 }
 0x24e   :  { %v485_v44 = vadd.f32 %v474_v17, %v459_v37  ;;  %v617_v17 = vsel %vm265_vm4, %v615_v19, %v616_v6 }
 0x250   :  { %v476_v28 = vpop.permute.xlu1 %475  ;;  %v517_v51 = vadd.f32 %v505_v16, %v485_v44 }
 0x251   :  { %v478_v29 = vpop.permute.xlu0 %477  ;;  %v486_v11 = vadd.f32 %v476_v28, %v460_v35 }
 0x252   :  { %v487_v60 = vadd.f32 %v478_v29, %v461_v47 }
 0x253   :  { %v518_v9 = vadd.f32 %v507_v62, %v486_v11 }
 0x254   :  { %v480_v20 = vpop.permute.xlu1 %479  ;;  %v519_v18 = vadd.f32 %v510_v12, %v487_v60 }
 0x255   :  { %v546_v31 = vpop.permute.xlu0 %545  ;;  %v488_v7 = vadd.f32 %v480_v20, %v462_v63 }
 0x256   :  { %v557_v3 = vadd.f32 %v546_v31, %v517_v51 }
 0x257   :  { %v520_v26 = vadd.f32 %v512_v23, %v488_v7 }
 0x258   :  { %v548_v32 = vpop.permute.xlu1 %547 }
 0x259   :  { %v550_v34 = vpop.permute.xlu0 %549  ;;  %v558_v59 = vadd.f32 %v548_v32, %v518_v9  ;;  %v620_v32 = vrot.slane %v606_v5, 2 }
 0x25a   :  { %v559_v21 = vadd.f32 %v550_v34, %v519_v18  ;;  %v623_v34 = vrot.slane %v608_v25, 2 }
 0x25b   :  { %v622_v38 = vsel %vm265_vm4, %v620_v32, %v621_v0 }
 0x25c   :  { %v552_v39 = vpop.permute.xlu1 %551 }
 0x25d   :  { %v586_v42 = vpop.permute.xlu0 %585  ;;  %v560_v31 = vadd.f32 %v552_v39, %v520_v26 }
 0x25e   :  { %v597_v61 = vadd.f32 %v586_v42, %v557_v3  ;;  %v624_v42 = vsel %vm265_vm4, %v621_v0, %v623_v34 }
 0x260   :  { %v588_v55 = vpop.permute.xlu1 %587  ;;  %v629_v20 = vadd.f32 %v617_v17, %v597_v61 }
 0x261   :  { %v590_v58 = vpop.permute.xlu0 %589  ;;  %v598_v27 = vadd.f32 %v588_v55, %v558_v59 }
 0x262   :  { %v599_v29 = vadd.f32 %v590_v58, %v559_v21 }
 0x263   :  { %v630_v37 = vadd.f32 %v619_v53, %v598_v27  ;;  %v871_v53 = vstv %s1144_s3 }
 0x264   :  { %v592_v48 = vpop.permute.xlu1 %591  ;;  %v631_v15 = vadd.f32 %v622_v38, %v599_v29  ;;  %v813_v29 = vstv %s1142_s30 }
 0x265   :  { %v658_v30 = vpop.permute.xlu0 %657  ;;  %v600_v36 = vadd.f32 %v592_v48, %v560_v31 }
 0x266   :  { %v669_v33 = vadd.f32 %v658_v30, %v629_v20 }
 0x267   :  { %v632_v39 = vadd.f32 %v624_v42, %v600_v36  ;;  %v911_v36 = vstv %s1145_s4 }
 0x268   :  { %v660_v2 = vpop.permute.xlu1 %659 }
 0x269   :  { %v662_v28 = vpop.permute.xlu0 %661  ;;  %v670_v10 = vadd.f32 %v660_v2, %v630_v37 }
 0x26a   :  { %v671_v41 = vadd.f32 %v662_v28, %v631_v15 }
 0x26c   :  { %v664_v14 = vpop.permute.xlu1 %663 }
 0x26d   :  { %v698_v8 = vpop.permute.xlu0 %697  ;;  %v672_v50 = vadd.f32 %v664_v14, %v632_v39  ;;  %v839_v39 = vstv %s1143_s5 }
 0x26e   :  { %v709_v40 = vadd.f32 %v698_v8, %v669_v33 }
 0x270   :  { %v1137_v43 = vadd.f32 -0.5, %v709_v40  ;;  %v700_v44 = vpop.permute.xlu1 %699 }
 0x271   :  { %v710_v35 = vadd.f32 %v700_v44, %v670_v10  ;;  %v702_v45 = vpop.permute.xlu0 %701 }
 0x272   :  { %v717_v22 = vmul.f32 100.0, %v1137_v43  ;;  %v711_v47 = vadd.f32 %v702_v45, %v671_v41 }
 0x273   :  { %v1138_v54 = vadd.f32 -0.5, %v710_v35  ;;  %v951_v35 = vstv %s1146_s6 }
 0x274   :  { %v721_v55 = vsub.f32 0.0, %v717_v22  ;;  %v1139_v56 = vadd.f32 -0.5, %v711_v47  ;;  %v704_v57 = vpop.permute.xlu1 %703 }
 0x275   :  { %v718_v11 = vmul.f32 100.0, %v1138_v54  ;;  %v712_v16 = vadd.f32 %v704_v57, %v672_v50 }
 0x276   :  { %v725_v46 = vmul.f32 1.442695, %v721_v55  ;;  %v719_v58 = vmul.f32 100.0, %v1139_v56 }
 0x277   :  { %v722_v60 = vsub.f32 0.0, %v718_v11  ;;  %v1140_v51 = vadd.f32 -0.5, %v712_v16  ;;  %v1698_v11 = vstv %s1147_s7 }
 0x278   :  { %1178 = vpow2.f32 %v725_v46  ;;  %v723_v63 = vsub.f32 0.0, %v719_v58 }
 0x279   :  { %v727_v52 = vmul.f32 1.442695, %v722_v60  ;;  %v720_v1 = vmul.f32 100.0, %v1140_v51 }
 0x27a   :  { %v729_v49 = vmul.f32 1.442695, %v723_v63 }
 0x27b   :  { %1180 = vpow2.f32 %v727_v52  ;;  %v724_v3 = vsub.f32 0.0, %v720_v1 }
 0x27c   :  { %1182 = vpow2.f32 %v729_v49 }
 0x27d   :  { %v731_v62 = vmul.f32 1.442695, %v724_v3 }
 0x27f   :  { %1184 = vpow2.f32 %v731_v62 }
 0x285   :  { %v1179_v4 = vpop.eup %1178 }
 0x286   :  { %v733_v48 = vadd.f32 1.0, %v1179_v4 }
 0x288   :  { %v1181_v6 = vpop.eup %1180  ;;  %1186 = vrcp.f32 %v733_v48 }
 0x289   :  { %v1183_v7 = vpop.eup %1182  ;;  %v734_v9 = vadd.f32 1.0, %v1181_v6 }
 0x28a   :  { %v735_v12 = vadd.f32 1.0, %v1183_v7 }
 0x28b   :  { %1188 = vrcp.f32 %v734_v9 }
 0x28c   :  { %v1185_v30 = vpop.eup %1184  ;;  %1190 = vrcp.f32 %v735_v12 }
 0x28d   :  { %v736_v13 = vadd.f32 1.0, %v1185_v30 }
 0x28f   :  { %1192 = vrcp.f32 %v736_v13 }
 0x295   :  { %v1187_v18 = vpop.eup %1186 }
 0x296   :  { %746 = vst.msk [vmem:[#allocation8 + $0x20] sm:$0xff] %vm396_vm5, %v1187_v18  ;;  %754 = vrot.lane.b32.xlu0 %v1187_v18, %s1268_s0 }
 0x298   :  { %v1189_v61 = vpop.eup %1188 }
 0x299   :  { %v1191_v59 = vpop.eup %1190  ;;  %747 = vst.msk [vmem:[#allocation8 + $0x28] sm:$0xff] %vm396_vm5, %v1189_v61  ;;  %756 = vrot.lane.b32.xlu1 %v1189_v61, %s1268_s0 }
 0x29a   :  { %748 = vst.msk [vmem:[#allocation8 + $0x30] sm:$0xff] %vm396_vm5, %v1191_v59  ;;  %758 = vrot.lane.b32.xlu0 %v1191_v59, %s1268_s0 }
 0x29c   :  { %v1193_v19 = vpop.eup %1192 }
 0x29d   :  { %749 = vst.msk [vmem:[#allocation8 + $0x38] sm:$0xff] %vm396_vm5, %v1193_v19  ;;  %760 = vrot.lane.b32.xlu1 %v1193_v19, %s1268_s0 }
 0x308   :  { %v755_v5 = vpop.permute.xlu0 %754 }
 0x309   :  { %766 = vst.msk [vmem:[#allocation2 + $0x1] sm:$0xff] %vm65_vm2, %v755_v5 }
 0x30b   :  { %v757_v21 = vpop.permute.xlu1 %756 }
 0x30c   :  { %767 = vst.msk [vmem:[#allocation2 + $0x9] sm:$0xff] %vm65_vm2, %v757_v21  ;;  %v759_v23 = vpop.permute.xlu0 %758 }
 0x30d   :  { %768 = vst.msk [vmem:[#allocation2 + $0x19] sm:$0xff] %vm65_vm2, %v759_v23 }
 0x30f   :  { %v761_v2 = vpop.permute.xlu1 %760 }
 0x310   :  { %769 = vst.msk [vmem:[#allocation2 + $0x21] sm:$0xff] %vm65_vm2, %v761_v2  ;;  %v1659_v25 = vld [vmem:[#allocation2] sm:$0xff] }
 0x311   :  { %v788_v26 = vmul.f32 %v787_v24, %v1659_v25  ;;  %v814_v33 = vmul.f32 %v813_v29, %v1659_v25  ;;  %v872_v15 = vmul.f32 %v871_v53, %v1659_v25  ;;  %v912_v42 = vmul.f32 %v911_v36, %v1659_v25 }
 0x312   :  { %v840_v16 = vmul.f32 %v839_v39, %v1659_v25  ;;  %v952_v46 = vmul.f32 %v951_v35, %v1659_v25 }
 0x313   :  { %796 = vrot.lane.b32.xlu0 %v788_v26, %s1270_s21  ;;  %v1663_v27 = vld [vmem:[#allocation2 + $0x8] sm:$0xff]  ;;  %v1674_v32 = vld [vmem:[#allocation2 + $0x10] sm:$0x3]  ;;  %v884_v54 = vrot.slane %v872_v15, 1  ;;  %v924_v57 = vrot.slane %v912_v42, 1 }
 0x314   :  { %v789_v17 = vmul.f32 %v787_v24, %v1663_v27  ;;  %v1666_v0 = vld [vmem:[#allocation2 + $0x18] sm:$0xff]  ;;  %v873_v14 = vmul.f32 %v871_v53, %v1663_v27  ;;  %v874_v37 = vmul.f32 %v871_v53, %v1674_v32  ;;  %v1684_v38 = vmul.f32 %v911_v36, %v1663_v27 }
 0x315   :  { %v790_v28 = vmul.f32 %v787_v24, %v1666_v0  ;;  %v815_v8 = vmul.f32 %v813_v29, %v1663_v27  ;;  %v816_v41 = vmul.f32 %v813_v29, %v1666_v0  ;;  %v875_v44 = vmul.f32 %v871_v53, %v1666_v0 }
 0x316   :  { %798 = vrot.lane.b32.xlu1 %v789_v17, %s1270_s21  ;;  %v885_v43 = vrot.slane %v873_v14, 1  ;;  %v887_v45 = vrot.slane %v874_v37, 1  ;;  %v925_v22 = vrot.slane %v1684_v38, 1  ;;  %v914_v47 = vmul.f32 %v911_v36, %v1674_v32 }
 0x317   :  { %800 = vrot.lane.b32.xlu0 %v790_v28, %s1270_s21  ;;  %v1671_v20 = vld [vmem:[#allocation2 + $0x20] sm:$0xff]  ;;  %v1677_v34 = vld [vmem:[#allocation2 + $0x28] sm:$0x3]  ;;  %v889_v60 = vrot.slane %v875_v44, 1  ;;  %v915_v51 = vmul.f32 %v911_v36, %v1666_v0  ;;  %v1707_v63 = vmul.f32 %v1698_v11, %v1663_v27  ;;  %v841_v6 = vmul.f32 %v839_v39, %v1663_v27 }
 0x318   :  { %v791_v31 = vmul.f32 %v787_v24, %v1671_v20  ;;  %v876_v40 = vmul.f32 %v871_v53, %v1671_v20  ;;  %v877_v10 = vmul.f32 %v871_v53, %v1677_v34  ;;  %v817_v50 = vmul.f32 %v813_v29, %v1671_v20 }
 0x319   :  { %v886_v58 = vsel %vm152_vm3, %v884_v54, %v885_v43  ;;  %v888_v52 = vsel %vm152_vm3, %v885_v43, %v887_v45  ;;  %v926_v1 = vsel %vm152_vm3, %v924_v57, %v925_v22  ;;  %v927_v49 = vrot.slane %v914_v47, 1 }
 0x31a   :  { %802 = vrot.lane.b32.xlu1 %v791_v31, %s1270_s21  ;;  %v890_v55 = vrot.slane %v876_v40, 1  ;;  %v892_v56 = vrot.slane %v877_v10, 1  ;;  %v916_v3 = vmul.f32 %v911_v36, %v1671_v20  ;;  %v917_v48 = vmul.f32 %v911_v36, %v1677_v34 }
 0x31b   :  { %822 = vrot.lane.b32.xlu0 %v814_v33, %s1271_s23  ;;  %v852_v7 = vrot.slane %v840_v16, 1  ;;  %v842_v9 = vmul.f32 %v839_v39, %v1674_v32  ;;  %v843_v12 = vmul.f32 %v839_v39, %v1666_v0  ;;  %v844_v30 = vmul.f32 %v839_v39, %v1671_v20 }
 0x31c   :  { %v891_v62 = vsel %vm152_vm3, %v889_v60, %v890_v55  ;;  %v893_v4 = vsel %vm152_vm3, %v890_v55, %v892_v56  ;;  %v853_v13 = vrot.slane %v841_v6, 1  ;;  %v845_v18 = vmul.f32 %v839_v39, %v1677_v34 }
 0x31d   :  { %v953_v61 = vmul.f32 %v951_v35, %v1663_v27  ;;  %v964_v59 = vrot.slane %v952_v46, 2  ;;  %v855_v19 = vrot.slane %v842_v9, 1  ;;  %v857_v5 = vrot.slane %v843_v12, 1 }
 0x31e   :  { %824 = vrot.lane.b32.xlu1 %v815_v8, %s1271_s23  ;;  %v858_v21 = vrot.slane %v844_v30, 1  ;;  %v954_v23 = vmul.f32 %v951_v35, %v1674_v32  ;;  %v1726_v24 = vsel %vm152_vm3, %v852_v7, %v853_v13  ;;  %v860_v2 = vrot.slane %v845_v18, 1 }
 0x31f   :  { %826 = vrot.lane.b32.xlu0 %v816_v41, %s1271_s23  ;;  %v965_v26 = vrot.slane %v953_v61, 2  ;;  %v955_v17 = vmul.f32 %v951_v35, %v1666_v0  ;;  %v1732_v28 = vsel %vm152_vm3, %v853_v13, %v855_v19  ;;  %v956_v33 = vmul.f32 %v951_v35, %v1671_v20 }
 0x320   :  { %v1735_v29 = vsel %vm152_vm3, %v857_v5, %v858_v21  ;;  %v967_v31 = vrot.slane %v954_v23, 2  ;;  %v930_v53 = vrot.slane %v916_v3, 1  ;;  %v1740_v14 = vsel %vm152_vm3, %v858_v21, %v860_v2 }
 0x321   :  { %v1743_v36 = vsel %vm265_vm4, %v964_v59, %v965_v26  ;;  %v957_v37 = vmul.f32 %v951_v35, %v1677_v34  ;;  %v969_v8 = vrot.slane %v955_v17, 2  ;;  %v970_v15 = vrot.slane %v956_v33, 2 }
 0x322   :  { %828 = vrot.lane.b32.xlu1 %v817_v50, %s1271_s23  ;;  %v1748_v38 = vsel %vm265_vm4, %v965_v26, %v967_v31  ;;  %v929_v40 = vrot.slane %v915_v51, 1  ;;  %v984_v10 = vmul.f32 %v1698_v11, %v1659_v25  ;;  %v928_v42 = vsel %vm152_vm3, %v925_v22, %v927_v49 }
 0x323   :  { %894 = vrot.lane.b32.xlu0 %v886_v58, %s1270_s21  ;;  %v972_v41 = vrot.slane %v957_v37, 2  ;;  %v932_v43 = vrot.slane %v917_v48, 1  ;;  %v986_v44 = vmul.f32 %v1698_v11, %v1674_v32  ;;  %v1756_v39 = vsel %vm265_vm4, %v969_v8, %v970_v15 }
 0x324   :  { %v931_v35 = vsel %vm152_vm3, %v929_v40, %v930_v53  ;;  %v997_v45 = vrot.slane %v1707_v63, 2  ;;  %v988_v47 = vmul.f32 %v1698_v11, %v1671_v20  ;;  %v996_v22 = vrot.slane %v984_v10, 2 }
 0x325   :  { %v1764_v50 = vsel %vm265_vm4, %v970_v15, %v972_v41  ;;  %v987_v54 = vmul.f32 %v1698_v11, %v1666_v0  ;;  %v933_v55 = vsel %vm152_vm3, %v930_v53, %v932_v43  ;;  %v999_v56 = vrot.slane %v986_v44, 2 }
 0x326   :  { %896 = vrot.lane.b32.xlu1 %v888_v52, %s1270_s21  ;;  %v989_v57 = vmul.f32 %v1698_v11, %v1677_v34  ;;  %v1023_v16 = vstv %s1729_s8  ;;  %v998_v46 = vsel %vm265_vm4, %v996_v22, %v997_v45  ;;  %v1002_v58 = vrot.slane %v988_v47, 2 }
 0x327   :  { %898 = vrot.lane.b32.xlu0 %v891_v62, %s1270_s21  ;;  %v1025_v60 = vmul.f32 %v1023_v16, %v1663_v27  ;;  %v1001_v51 = vrot.slane %v987_v54, 2  ;;  %v1024_v63 = vmul.f32 %v1023_v16, %v1659_v25  ;;  %v1000_v52 = vsel %vm265_vm4, %v997_v45, %v999_v56 }
 0x328   :  { %v1026_v49 = vmul.f32 %v1023_v16, %v1674_v32  ;;  %v1028_v62 = vmul.f32 %v1023_v16, %v1671_v20  ;;  %v1027_v48 = vmul.f32 %v1023_v16, %v1666_v0  ;;  %v1029_v9 = vmul.f32 %v1023_v16, %v1677_v34 }
 0x329   :  { %v1003_v11 = vsel %vm265_vm4, %v1001_v51, %v1002_v58  ;;  %v1037_v3 = vrot.slane %v1025_v60, 2  ;;  %v777_v19 = vstv %s776_s9 }
 0x32a   :  { %900 = vrot.lane.b32.xlu1 %v893_v4, %s1270_s21  ;;  %v1036_v4 = vrot.slane %v1024_v63, 2  ;;  %v1039_v7 = vrot.slane %v1026_v49, 2  ;;  %v1042_v12 = vrot.slane %v1028_v62, 2  ;;  %v1041_v30 = vrot.slane %v1027_v48, 2 }
 0x32b   :  { %934 = vrot.lane.b32.xlu0 %v926_v1, %s1271_s23  ;;  %v1004_v1 = vrot.slane %v989_v57, 2  ;;  %v1044_v18 = vrot.slane %v1029_v9, 2  ;;  %v778_v23 = vmul.f32 %v777_v19, %v1659_v25  ;;  %v779_v17 = vmul.f32 %v777_v19, %v1663_v27 }
 0x32c   :  { %v1038_v32 = vsel %vm265_vm4, %v1036_v4, %v1037_v3  ;;  %v1040_v13 = vsel %vm265_vm4, %v1037_v3, %v1039_v7  ;;  %v1043_v61 = vsel %vm265_vm4, %v1041_v30, %v1042_v12  ;;  %v780_v33 = vmul.f32 %v777_v19, %v1666_v0 }
 0x32d   :  { %v1005_v6 = vsel %vm265_vm4, %v1002_v58, %v1004_v1  ;;  %v1045_v59 = vsel %vm265_vm4, %v1042_v12, %v1044_v18  ;;  %v781_v10 = vmul.f32 %v777_v19, %v1671_v20 }
 0x32e   :  { %936 = vrot.lane.b32.xlu1 %v928_v42, %s1271_s23 }
 0x32f   :  { %938 = vrot.lane.b32.xlu0 %v931_v35, %s1271_s23 }
 0x332   :  { %940 = vrot.lane.b32.xlu1 %v933_v55, %s1271_s23 }
 0x333   :  { %1006 = vrot.lane.b32.xlu0 %v998_v46, %s1270_s21 }
 0x336   :  { %1008 = vrot.lane.b32.xlu1 %v1000_v52, %s1270_s21 }
 0x337   :  { %1010 = vrot.lane.b32.xlu0 %v1003_v11, %s1270_s21 }
 0x33a   :  { %1012 = vrot.lane.b32.xlu1 %v1005_v6, %s1270_s21 }
 0x33b   :  { %1046 = vrot.lane.b32.xlu0 %v1038_v32, %s1271_s23 }
 0x33e   :  { %1048 = vrot.lane.b32.xlu1 %v1040_v13, %s1271_s23 }
 0x33f   :  { %1050 = vrot.lane.b32.xlu0 %v1043_v61, %s1271_s23 }
 0x342   :  { %1052 = vrot.lane.b32.xlu1 %v1045_v59, %s1271_s23 }
 0x385   :  { %v797_v34 = vpop.permute.xlu0 %796 }
 0x386   :  { %v808_v2 = vadd.f32 %v797_v34, %v778_v23 }
 0x388   :  { %v799_v5 = vpop.permute.xlu1 %798 }
 0x389   :  { %v801_v21 = vpop.permute.xlu0 %800  ;;  %v809_v37 = vadd.f32 %v799_v5, %v779_v17 }
 0x38a   :  { %v810_v8 = vadd.f32 %v801_v21, %v780_v33 }
 0x38c   :  { %v803_v26 = vpop.permute.xlu1 %802 }
 0x38d   :  { %v823_v31 = vpop.permute.xlu0 %822  ;;  %v811_v44 = vadd.f32 %v803_v26, %v781_v10 }
 0x38e   :  { %v834_v53 = vadd.f32 %v823_v31, %v808_v2 }
 0x390   :  { %v825_v15 = vpop.permute.xlu1 %824  ;;  %v866_v40 = vadd.f32 %v1726_v24, %v834_v53 }
 0x391   :  { %v835_v41 = vadd.f32 %v825_v15, %v809_v37  ;;  %v827_v42 = vpop.permute.xlu0 %826 }
 0x392   :  { %v836_v43 = vadd.f32 %v827_v42, %v810_v8 }
 0x393   :  { %v867_v25 = vadd.f32 %v1732_v28, %v835_v41 }
 0x394   :  { %v829_v35 = vpop.permute.xlu1 %828  ;;  %v868_v27 = vadd.f32 %v1735_v29, %v836_v43 }
 0x395   :  { %v837_v45 = vadd.f32 %v829_v35, %v811_v44  ;;  %v895_v47 = vpop.permute.xlu0 %894 }
 0x396   :  { %v906_v55 = vadd.f32 %v895_v47, %v866_v40 }
 0x397   :  { %v869_v0 = vadd.f32 %v1740_v14, %v837_v45 }
 0x398   :  { %v897_v22 = vpop.permute.xlu1 %896 }
 0x399   :  { %v899_v54 = vpop.permute.xlu0 %898  ;;  %v907_v20 = vadd.f32 %v897_v22, %v867_v25 }
 0x39a   :  { %v908_v16 = vadd.f32 %v899_v54, %v868_v27 }
 0x39c   :  { %v901_v56 = vpop.permute.xlu1 %900 }
 0x39d   :  { %v935_v24 = vpop.permute.xlu0 %934  ;;  %v909_v63 = vadd.f32 %v901_v56, %v869_v0 }
 0x39e   :  { %v946_v57 = vadd.f32 %v935_v24, %v906_v55 }
 0x3a0   :  { %v937_v46 = vpop.permute.xlu1 %936  ;;  %v978_v58 = vadd.f32 %v1743_v36, %v946_v57 }
 0x3a1   :  { %v947_v60 = vadd.f32 %v937_v46, %v907_v20  ;;  %v939_v28 = vpop.permute.xlu0 %938 }
 0x3a2   :  { %v948_v51 = vadd.f32 %v939_v28, %v908_v16 }
 0x3a3   :  { %v979_v29 = vadd.f32 %v1748_v38, %v947_v60 }
 0x3a4   :  { %v941_v52 = vpop.permute.xlu1 %940  ;;  %v980_v14 = vadd.f32 %v1756_v39, %v948_v51 }
 0x3a5   :  { %v949_v1 = vadd.f32 %v941_v52, %v909_v63  ;;  %v1007_v49 = vpop.permute.xlu0 %1006 }
 0x3a6   :  { %v1018_v4 = vadd.f32 %v1007_v49, %v978_v58 }
 0x3a7   :  { %v981_v11 = vadd.f32 %v1764_v50, %v949_v1 }
 0x3a8   :  { %v1009_v3 = vpop.permute.xlu1 %1008 }
 0x3a9   :  { %v1011_v62 = vpop.permute.xlu0 %1010  ;;  %v1019_v36 = vadd.f32 %v1009_v3, %v979_v29 }
 0x3aa   :  { %v1020_v9 = vadd.f32 %v1011_v62, %v980_v14 }
 0x3ac   :  { %v1013_v48 = vpop.permute.xlu1 %1012 }
 0x3ad   :  { %v1047_v6 = vpop.permute.xlu0 %1046  ;;  %v1021_v61 = vadd.f32 %v1013_v48, %v981_v11 }
 0x3ae   :  { %v1058_v7 = vadd.f32 %v1047_v6, %v1018_v4 }
 0x3b0   :  { %v1149_v32 = vadd.f32 -0.5, %v1058_v7  ;;  %v1049_v12 = vpop.permute.xlu1 %1048 }
 0x3b1   :  { %v1059_v30 = vadd.f32 %v1049_v12, %v1019_v36  ;;  %v1051_v13 = vpop.permute.xlu0 %1050 }
 0x3b2   :  { %v1066_v38 = vmul.f32 100.0, %v1149_v32  ;;  %v1060_v18 = vadd.f32 %v1051_v13, %v1020_v9 }
 0x3b3   :  { %v1150_v39 = vadd.f32 -0.5, %v1059_v30 }
 0x3b4   :  { %v1070_v59 = vsub.f32 0.0, %v1066_v38  ;;  %v1151_v34 = vadd.f32 -0.5, %v1060_v18  ;;  %v1053_v19 = vpop.permute.xlu1 %1052 }
 0x3b5   :  { %v1067_v50 = vmul.f32 100.0, %v1150_v39  ;;  %v1061_v5 = vadd.f32 %v1053_v19, %v1021_v61 }
 0x3b6   :  { %v1074_v21 = vmul.f32 1.442695, %v1070_v59  ;;  %v1068_v23 = vmul.f32 100.0, %v1151_v34 }
 0x3b7   :  { %v1071_v2 = vsub.f32 0.0, %v1067_v50  ;;  %v1152_v26 = vadd.f32 -0.5, %v1061_v5 }
 0x3b8   :  { %1194 = vpow2.f32 %v1074_v21  ;;  %v1072_v17 = vsub.f32 0.0, %v1068_v23 }
 0x3b9   :  { %v1076_v31 = vmul.f32 1.442695, %v1071_v2  ;;  %v1069_v33 = vmul.f32 100.0, %v1152_v26 }
 0x3ba   :  { %v1078_v53 = vmul.f32 1.442695, %v1072_v17 }
 0x3bb   :  { %1196 = vpow2.f32 %v1076_v31  ;;  %v1073_v37 = vsub.f32 0.0, %v1069_v33 }
 0x3bc   :  { %1198 = vpow2.f32 %v1078_v53 }
 0x3bd   :  { %v1080_v8 = vmul.f32 1.442695, %v1073_v37 }
 0x3bf   :  { %1200 = vpow2.f32 %v1080_v8 }
 0x3c5   :  { %v1195_v15 = vpop.eup %1194 }
 0x3c6   :  { %v1082_v40 = vadd.f32 1.0, %v1195_v15 }
 0x3c8   :  { %v1197_v10 = vpop.eup %1196  ;;  %1202 = vrcp.f32 %v1082_v40 }
 0x3c9   :  { %v1199_v41 = vpop.eup %1198  ;;  %v1083_v42 = vadd.f32 1.0, %v1197_v10 }
 0x3ca   :  { %v1084_v43 = vadd.f32 1.0, %v1199_v41 }
 0x3cb   :  { %1204 = vrcp.f32 %v1083_v42 }
 0x3cc   :  { %v1201_v44 = vpop.eup %1200  ;;  %1206 = vrcp.f32 %v1084_v43 }
 0x3cd   :  { %v1085_v25 = vadd.f32 1.0, %v1201_v44 }
 0x3cf   :  { %1208 = vrcp.f32 %v1085_v25 }
 0x3d5   :  { %v1203_v35 = vpop.eup %1202 }
 0x3d6   :  { %1095 = vst.msk [vmem:[#allocation8 + $0x40] sm:$0xff] %vm396_vm5, %v1203_v35 }
 0x3d8   :  { %v1205_v27 = vpop.eup %1204 }
 0x3d9   :  { %v1207_v45 = vpop.eup %1206  ;;  %1096 = vst.msk [vmem:[#allocation8 + $0x48] sm:$0xff] %vm396_vm5, %v1205_v27 }
 0x3da   :  { %1097 = vst.msk [vmem:[#allocation8 + $0x50] sm:$0xff] %vm396_vm5, %v1207_v45 }
 0x3dc   :  { %v1209_v47 = vpop.eup %1208 }
 0x3dd   :  { %1098 = vst.msk [vmem:[#allocation8 + $0x58] sm:$0xff] %vm396_vm5, %v1209_v47 }
 0x3de   :  { %1249 = shalt.err (!%p1246_p9)
}
 0x3df   :  { %1110 = dma.vmem_to_hbm [thread:$0]  %s1105_s11, 1536, %s1820_s2, [#allocation5], %s1266_s15, %s1266_s15, %s1267_s16  }
 0x3e0   :  { %1262 = dma.done.wait [#allocation5], 1536  }
 0x3e1   :  { %1263 = vsyncadd [#allocation5], 4294965760 }
 0x3e2   :  { %1114 = vsyncpa [#allocation4], 1 }
 0x3e3   :  { %1115 = vsyncpa [#allocation5], 1 }
 0x3e4   :  { %1116 = vsyncpa [#allocation6], 1 }

</bundles_post_ra>
